<compile_context>
chip_gen: v7x
topology: tpu7x:2x2x1
jax: 0.10.0
libtpu: 0.0.40
codegen_flags: <defaults>
</compile_context>

<pallas_src>
import functools

import jax
import jax.numpy as jnp
import numpy as np
from jax.experimental import pallas as pl
from jax.experimental.pallas import tpu as pltpu

LEAKY_SLOPE = 0.01   # PyTorch nn.LeakyReLU default negative_slope
LANES = 128


def _round_up(x, m):
    return ((x + m - 1) // m) * m


def _state_encoder_kernel(ids_ref, emb_ref, w1_ref, b1_ref, w2_ref, b2_ref,
                          out_ref, *, W, L, K, L2):
    """One grid step: Bt batch rows, curr & end words fused.

    ids_ref : (1, N, 1) int32, N = Bt*2W*L (curr words then end words per batch row)
    emb_ref : (V_pad, E_pad)   bf16 zero-padded embedding table
    w1_ref  : (K*E_pad, H_pad) bf16 conv1 weights, tap-major rows
    b1_ref  : (1, H_pad)       f32
    w2_ref  : (K*H_pad, H_pad) bf16 conv2 weights
    b2_ref  : (1, H_pad)       f32
    out_ref : (1, Bt, H_pad)   f32 state-representation block
    """
    ids = ids_ref[0]                       # (N, 1)
    N = ids.shape[0]
    V_pad = emb_ref.shape[0]
    H_pad = out_ref.shape[2]
    Bt = out_ref.shape[1]
    n_words = N // L                       # Bt * 2W

    # ---- fused embedding lookup: bf16 one-hot @ bf16 table on the MXU, f32 acc ----
    vocab_iota = jax.lax.broadcasted_iota(jnp.int32, (N, V_pad), 1)
    onehot = (ids == vocab_iota).astype(jnp.bfloat16)                       # (N, V_pad)
    x = jnp.dot(onehot, emb_ref[...], preferred_element_type=jnp.float32)   # (N, E_pad) f32

    def shift_rows(v, k):
        # rows shifted up by k: result[i] = v[(i + k) % N]; wrapped / boundary-crossing
        # rows only feed positions that are masked out before the max (num_layers==2:
        # invalid layer-1 rows >= L1 only reach layer-2 positions >= L2, masked below).
        if k == 0:
            return v
        return pltpu.roll(v, shift=(N - k) % N, axis=0)

    # ---- conv layer 1: single im2col matmul (bf16 operands), bias added once ------
    x1 = jnp.concatenate([shift_rows(x, k) for k in range(K)],
                         axis=1).astype(jnp.bfloat16)                       # (N, K*E_pad)
    y1 = jnp.dot(x1, w1_ref[...], preferred_element_type=jnp.float32) + b1_ref[...]
    y1 = jnp.where(y1 >= 0, y1, LEAKY_SLOPE * y1)          # LeakyReLU in f32 (Dropout == id)

    # ---- conv layer 2 ---------------------------------------------------------------
    x2 = jnp.concatenate([shift_rows(y1, k) for k in range(K)],
                         axis=1).astype(jnp.bfloat16)                       # (N, K*H_pad)
    y2 = jnp.dot(x2, w2_ref[...], preferred_element_type=jnp.float32) + b2_ref[...]

    # ---- max over the L2 valid conv positions of every word (one f32 reduction) ----
    y2w = y2.reshape(n_words, L, H_pad)
    pos = jax.lax.broadcasted_iota(jnp.int32, (n_words, L, H_pad), 1)
    word_repr = jnp.max(jnp.where(pos < L2, y2w, -jnp.inf), axis=1)         # (n_words, H_pad)

    # ---- (curr - end).mean(word) as one signed reduction ----------------------------
    wr = word_repr.reshape(Bt, 2 * W, H_pad)
    widx = jax.lax.broadcasted_iota(jnp.int32, (Bt, 2 * W, H_pad), 1)
    sign = jnp.where(widx < W, 1.0 / W, -1.0 / W)
    out_ref[0] = jnp.sum(wr * sign, axis=1).astype(out_ref.dtype)           # (Bt, H_pad)


def state_encoder_forward(curr_ids, end_ids, emb_table, w1, b1, w2, b2):
    """StateEncoder.forward for repr_mode='state' (almts=None), eval mode."""
    B, W, L = curr_ids.shape
    VOCAB, E = emb_table.shape
    K, _, H = w1.shape
    L1 = L - (K - 1)
    L2 = L1 - (K - 1)
    assert L2 >= 1, "need L >= 2*(kernel_size - 1) + 1"

    E_pad = _round_up(E, LANES)
    H_pad = _round_up(H, LANES)
    V_pad = _round_up(VOCAB, LANES)

    f32, bf16 = jnp.float32, jnp.bfloat16
    # Lane-dense, zero-padded parameters.  MXU operands stored as bf16 (accumulation
    # stays f32 in-kernel); biases stay f32 (added on the VPU after the matmul).
    emb_pad = jnp.zeros((V_pad, E_pad), bf16).at[:VOCAB, :E].set(emb_table.astype(bf16))
    w1_flat = (jnp.zeros((K, E_pad, H_pad), bf16).at[:, :E, :H].set(w1.astype(bf16))
               .reshape(K * E_pad, H_pad))
    w2_flat = (jnp.zeros((K, H_pad, H_pad), bf16).at[:, :H, :H].set(w2.astype(bf16))
               .reshape(K * H_pad, H_pad))
    b1_pad = jnp.zeros((1, H_pad), f32).at[:, :H].set(b1.astype(f32).reshape(1, H))
    b2_pad = jnp.zeros((1, H_pad), f32).at[:, :H].set(b2.astype(f32).reshape(1, H))

    # ---- VMEM-derived batch tile ------------------------------------------------
    rows_per_item = 2 * W * L                         # (word,pos) rows per batch item
    # Rough per-row live-intermediate footprint (bf16 matmul operands, f32 elementwise):
    # onehot + x + x1 + x2 in bf16, y1/y2/word-repr slabs in f32.
    bytes_per_row = (2 * V_pad + 2 * E_pad + 2 * K * E_pad + 2 * K * H_pad
                     + 3 * 4 * H_pad)
    budget_bytes = 12 << 20        # conservative: fits v5e 16 MiB scoped / v7x 64 MiB
    max_rows = max(rows_per_item, budget_bytes // bytes_per_row)
    target_rows = min(2048, max_rows)                 # MXU-friendly rows per grid step
    Bt = max(1, min(B, target_rows // rows_per_item))
    G = -(-B // Bt)
    if G > 1 and G % 2 == 1:
        G += 1                                        # even step count -> both v7x TCs
        Bt = -(-B // G)
    B_pad = G * Bt

    # curr and end fused along the word axis -> one pass over 2W words per batch row;
    # pad the batch to G*Bt (padding rows use id 0 and are sliced off afterwards).
    ids_cat = jnp.concatenate([curr_ids, end_ids], axis=1).astype(jnp.int32)  # (B, 2W, L)
    if B_pad > B:
        ids_cat = jnp.pad(ids_cat, ((0, B_pad - B), (0, 0), (0, 0)))
    Nt = Bt * 2 * W * L
    ids_blk = ids_cat.reshape(G, Nt, 1)

    kernel = functools.partial(_state_encoder_kernel, W=W, L=L, K=K, L2=L2)

    out = pl.pallas_call(
        kernel,
        out_shape=jax.ShapeDtypeStruct((G, Bt, H_pad), f32),
        grid=(G,),
        in_specs=[
            pl.BlockSpec((1, Nt, 1), lambda g: (g, 0, 0)),
            pl.BlockSpec((V_pad, E_pad), lambda g: (0, 0)),
            pl.BlockSpec((K * E_pad, H_pad), lambda g: (0, 0)),
            pl.BlockSpec((1, H_pad), lambda g: (0, 0)),
            pl.BlockSpec((K * H_pad, H_pad), lambda g: (0, 0)),
            pl.BlockSpec((1, H_pad), lambda g: (0, 0)),
        ],
        out_specs=pl.BlockSpec((1, Bt, H_pad), lambda g: (g, 0, 0)),
        compiler_params=pltpu.CompilerParams(
            dimension_semantics=("parallel",),
            vmem_limit_bytes=32 * 1024 * 1024),
    )(ids_blk, emb_pad, w1_flat, b1_pad, w2_flat, b2_pad)

    return out.reshape(B_pad, H_pad)[:B, :H]          # lane-dense slab -> real (B, H)


def state_encoder_reference(curr_ids, end_ids, emb_table, w1, b1, w2, b2):
    """Pure-JAX reference of the same forward pass (for verification)."""
    K, E, H = w1.shape

    def word_embedding(ids):
        x = emb_table[ids]                       # (B, W, L, E)
        L = x.shape[2]
        L1 = L - (K - 1)
        L2 = L1 - (K - 1)
        y1 = sum(jnp.einsum('bwle,eh->bwlh', x[:, :, k:k + L1, :], w1[k])
                 for k in range(K)) + b1
        y1 = jnp.where(y1 >= 0, y1, LEAKY_SLOPE * y1)
        y2 = sum(jnp.einsum('bwlh,hg->bwlg', y1[:, :, k:k + L2, :], w2[k])
                 for k in range(K)) + b2
        return jnp.max(y2, axis=2)               # (B, W, H)

    return (word_embedding(curr_ids) - word_embedding(end_ids)).mean(axis=1)


if __name__ == "__main__":
    # Small shapes consistent with the module:
    #   batch=2, words-per-state=4, chars-per-word=8, char-emb=32, cnn hidden=32,
    #   kernel_size=3, num_layers=2 (which requires input_size == hidden_size).
    B, W, L = 2, 4, 8
    E, H, K = 32, 32, 3
    VOCAB = 20

    key = jax.random.PRNGKey(0)
    k_ids_c, k_ids_e, k_emb, k_w1, k_b1, k_w2, k_b2 = jax.random.split(key, 7)

    curr_ids = jax.random.randint(k_ids_c, (B, W, L), 0, VOCAB, dtype=jnp.int32)
    end_ids = jax.random.randint(k_ids_e, (B, W, L), 0, VOCAB, dtype=jnp.int32)

    # Deterministic synthetic parameters (shapes from CharEmbedding / Cnn1dParams);
    # conv weights are tap-major (K, in, out), i.e. PyTorch (out, in, K) transposed.
    emb_table = 0.1 * jax.random.normal(k_emb, (VOCAB, E), jnp.float32)
    w1 = jax.random.normal(k_w1, (K, E, H), jnp.float32) / np.sqrt(E * K)
    b1 = 0.01 * jax.random.normal(k_b1, (1, H), jnp.float32)
    w2 = jax.random.normal(k_w2, (K, H, H), jnp.float32) / np.sqrt(H * K)
    b2 = 0.01 * jax.random.normal(k_b2, (1, H), jnp.float32)

    out = state_encoder_forward(curr_ids, end_ids, emb_table, w1, b1, w2, b2)
    out = jax.block_until_ready(out)

    ref = state_encoder_reference(curr_ids, end_ids, emb_table, w1, b1, w2, b2)
    np.testing.assert_allclose(np.asarray(out), np.asarray(ref), rtol=2e-2, atol=2e-2)

    print("KERNEL_OK")
</pallas_src>

<mosaic_0001>
module attributes {stable_mosaic.version = 11 : i64} {
  func.func @_state_encoder_kernel(%arg0: i32, %arg1: memref<1x128x1xi32, #tpu.memory_space<vmem>>, %arg2: memref<128x128xbf16, #tpu.memory_space<vmem>>, %arg3: memref<384x128xbf16, #tpu.memory_space<vmem>>, %arg4: memref<1x128xf32, #tpu.memory_space<vmem>>, %arg5: memref<384x128xbf16, #tpu.memory_space<vmem>>, %arg6: memref<1x128xf32, #tpu.memory_space<vmem>>, %arg7: memref<1x2x128xf32, #tpu.memory_space<vmem>>) attributes {dimension_semantics = [#tpu.dimension_semantics<parallel>], iteration_bounds = array<i64: 1>, scalar_prefetch = 0 : i64, scratch_operands = 0 : i64, tpu.core_type = #tpu.core_type<tc>, window_params = [{transform_indices = @transform_0, window_bounds = array<i64: 1, 128, 1>}, {pipeline_mode = #tpu.pipeline_mode<synchronous>, transform_indices = @transform_1, window_bounds = array<i64: 128, 128>}, {pipeline_mode = #tpu.pipeline_mode<synchronous>, transform_indices = @transform_2, window_bounds = array<i64: 384, 128>}, {pipeline_mode = #tpu.pipeline_mode<synchronous>, transform_indices = @transform_3, window_bounds = array<i64: 1, 128>}, {pipeline_mode = #tpu.pipeline_mode<synchronous>, transform_indices = @transform_4, window_bounds = array<i64: 384, 128>}, {pipeline_mode = #tpu.pipeline_mode<synchronous>, transform_indices = @transform_5, window_bounds = array<i64: 1, 128>}, {transform_indices = @transform_6, window_bounds = array<i64: 1, 2, 128>}]} {
    %c0 = arith.constant 0 : index
    %c0_0 = arith.constant 0 : index
    %c0_1 = arith.constant 0 : index
    %0 = vector.load %arg1[%c0, %c0_0, %c0_1] : memref<1x128x1xi32, #tpu.memory_space<vmem>>, vector<1x128x1xi32>
    %1 = vector.shape_cast %0 : vector<1x128x1xi32> to vector<128x1xi32>
    %2 = tpu.iota {dimensions = array<i32: 1>} : vector<128x128xi32>
    %3 = vector.broadcast %1 : vector<128x1xi32> to vector<128x128xi32>
    %4 = arith.cmpi eq, %3, %2 : vector<128x128xi32>
    %5 = arith.extui %4 : vector<128x128xi1> to vector<128x128xi32>
    %6 = arith.sitofp %5 : vector<128x128xi32> to vector<128x128xf32>
    %7 = arith.truncf %6 : vector<128x128xf32> to vector<128x128xbf16>
    %c0_2 = arith.constant 0 : index
    %c0_3 = arith.constant 0 : index
    %8 = vector.load %arg2[%c0_2, %c0_3] : memref<128x128xbf16, #tpu.memory_space<vmem>>, vector<128x128xbf16>
    %cst = arith.constant dense<0.000000e+00> : vector<128x128xf32>
    %9 = tpu.matmul %7, %8, %cst {dimension_numbers = #tpu.dot_dimension_numbers<[1], [0], [0], [1], [0, 0, 1, 1], [], []>} : vector<128x128xbf16>, vector<128x128xbf16>, vector<128x128xf32> -> vector<128x128xf32>
    %c127_i32 = arith.constant 127 : i32
    %10 = tpu.dynamic_rotate %9 by %c127_i32 dim 0 : vector<128x128xf32>, i32 -> vector<128x128xf32>
    %c126_i32 = arith.constant 126 : i32
    %11 = tpu.dynamic_rotate %9 by %c126_i32 dim 0 : vector<128x128xf32>, i32 -> vector<128x128xf32>
    %12 = tpu.concatenate %9, %10, %11 in 1 : vector<128x128xf32>, vector<128x128xf32>, vector<128x128xf32> -> vector<128x384xf32>
    %13 = arith.truncf %12 : vector<128x384xf32> to vector<128x384xbf16>
    %c0_4 = arith.constant 0 : index
    %c0_5 = arith.constant 0 : index
    %14 = vector.load %arg3[%c0_4, %c0_5] : memref<384x128xbf16, #tpu.memory_space<vmem>>, vector<384x128xbf16>
    %cst_6 = arith.constant dense<0.000000e+00> : vector<128x128xf32>
    %15 = tpu.matmul %13, %14, %cst_6 {dimension_numbers = #tpu.dot_dimension_numbers<[1], [0], [0], [1], [0, 0, 1, 1], [], []>} : vector<128x384xbf16>, vector<384x128xbf16>, vector<128x128xf32> -> vector<128x128xf32>
    %c0_7 = arith.constant 0 : index
    %c0_8 = arith.constant 0 : index
    %16 = vector.load %arg4[%c0_7, %c0_8] : memref<1x128xf32, #tpu.memory_space<vmem>>, vector<1x128xf32>
    %17 = vector.broadcast %16 : vector<1x128xf32> to vector<128x128xf32>
    %18 = arith.addf %15, %17 : vector<128x128xf32>
    %cst_9 = arith.constant 0.000000e+00 : f32
    %19 = vector.broadcast %cst_9 : f32 to vector<128x128xf32>
    %20 = arith.cmpf oge, %18, %19 : vector<128x128xf32>
    %cst_10 = arith.constant 0.00999999977 : f32
    %21 = vector.broadcast %cst_10 : f32 to vector<128x128xf32>
    %22 = arith.mulf %21, %18 : vector<128x128xf32>
    %23 = arith.select %20, %18, %22 : vector<128x128xi1>, vector<128x128xf32>
    %c127_i32_11 = arith.constant 127 : i32
    %24 = tpu.dynamic_rotate %23 by %c127_i32_11 dim 0 : vector<128x128xf32>, i32 -> vector<128x128xf32>
    %c126_i32_12 = arith.constant 126 : i32
    %25 = tpu.dynamic_rotate %23 by %c126_i32_12 dim 0 : vector<128x128xf32>, i32 -> vector<128x128xf32>
    %26 = tpu.concatenate %23, %24, %25 in 1 : vector<128x128xf32>, vector<128x128xf32>, vector<128x128xf32> -> vector<128x384xf32>
    %27 = arith.truncf %26 : vector<128x384xf32> to vector<128x384xbf16>
    %c0_13 = arith.constant 0 : index
    %c0_14 = arith.constant 0 : index
    %28 = vector.load %arg5[%c0_13, %c0_14] : memref<384x128xbf16, #tpu.memory_space<vmem>>, vector<384x128xbf16>
    %cst_15 = arith.constant dense<0.000000e+00> : vector<128x128xf32>
    %29 = tpu.matmul %27, %28, %cst_15 {dimension_numbers = #tpu.dot_dimension_numbers<[1], [0], [0], [1], [0, 0, 1, 1], [], []>} : vector<128x384xbf16>, vector<384x128xbf16>, vector<128x128xf32> -> vector<128x128xf32>
    %c0_16 = arith.constant 0 : index
    %c0_17 = arith.constant 0 : index
    %30 = vector.load %arg6[%c0_16, %c0_17] : memref<1x128xf32, #tpu.memory_space<vmem>>, vector<1x128xf32>
    %31 = vector.broadcast %30 : vector<1x128xf32> to vector<128x128xf32>
    %32 = arith.addf %29, %31 : vector<128x128xf32>
    %33 = vector.shape_cast %32 : vector<128x128xf32> to vector<16x8x128xf32>
    %34 = tpu.iota {dimensions = array<i32: 1>} : vector<16x8x128xi32>
    %c4_i32 = arith.constant 4 : i32
    %35 = vector.broadcast %c4_i32 : i32 to vector<16x8x128xi32>
    %36 = arith.cmpi slt, %34, %35 : vector<16x8x128xi32>
    %cst_18 = arith.constant 0xFF800000 : f32
    %37 = vector.broadcast %cst_18 : f32 to vector<16x8x128xf32>
    %38 = arith.select %36, %33, %37 : vector<16x8x128xi1>, vector<16x8x128xf32>
    %cst_19 = arith.constant dense<0xFF800000> : vector<16x128xf32>
    %39 = vector.multi_reduction <maximumf>, %38, %cst_19 [1] : vector<16x8x128xf32> to vector<16x128xf32>
    %40 = vector.shape_cast %39 : vector<16x128xf32> to vector<2x8x128xf32>
    %41 = tpu.iota {dimensions = array<i32: 1>} : vector<2x8x128xi32>
    %c4_i32_20 = arith.constant 4 : i32
    %42 = vector.broadcast %c4_i32_20 : i32 to vector<2x8x128xi32>
    %43 = arith.cmpi slt, %41, %42 : vector<2x8x128xi32>
    %cst_21 = arith.constant 2.500000e-01 : f32
    %cst_22 = arith.constant -2.500000e-01 : f32
    %44 = vector.broadcast %cst_21 : f32 to vector<2x8x128xf32>
    %45 = vector.broadcast %cst_22 : f32 to vector<2x8x128xf32>
    %46 = arith.select %43, %44, %45 : vector<2x8x128xi1>, vector<2x8x128xf32>
    %47 = arith.mulf %40, %46 : vector<2x8x128xf32>
    %cst_23 = arith.constant dense<0.000000e+00> : vector<2x128xf32>
    %48 = vector.multi_reduction <add>, %47, %cst_23 [1] : vector<2x8x128xf32> to vector<2x128xf32>
    %c0_24 = arith.constant 0 : index
    %c0_25 = arith.constant 0 : index
    %c0_26 = arith.constant 0 : index
    %49 = vector.load %arg7[%c0_24, %c0_25, %c0_26] : memref<1x2x128xf32, #tpu.memory_space<vmem>>, vector<1x2x128xf32>
    %50 = vector.shape_cast %49 : vector<1x2x128xf32> to vector<2x128xf32>
    %51 = vector.shape_cast %48 : vector<2x128xf32> to vector<1x2x128xf32>
    tpu.vector_store %arg7[%c0_24, %c0_25, %c0_26], %51 {strides = array<i32>} : memref<1x2x128xf32, #tpu.memory_space<vmem>>, vector<1x2x128xf32>,
    return
  }
  func.func @transform_0(%arg0: i32) -> (i32, i32, i32) {
    %c0_i32 = arith.constant 0 : i32
    %c0_i32_0 = arith.constant 0 : i32
    %c0_i32_1 = arith.constant 0 : i32
    return %arg0, %c0_i32, %c0_i32_0 : i32, i32, i32
  }
  func.func @transform_1(%arg0: i32) -> (i32, i32) {
    %c0_i32 = arith.constant 0 : i32
    %c0_i32_0 = arith.constant 0 : i32
    %c0_i32_1 = arith.constant 0 : i32
    return %c0_i32, %c0_i32_0 : i32, i32
  }
  func.func @transform_2(%arg0: i32) -> (i32, i32) {
    %c0_i32 = arith.constant 0 : i32
    %c0_i32_0 = arith.constant 0 : i32
    %c0_i32_1 = arith.constant 0 : i32
    return %c0_i32, %c0_i32_0 : i32, i32
  }
  func.func @transform_3(%arg0: i32) -> (i32, i32) {
    %c0_i32 = arith.constant 0 : i32
    %c0_i32_0 = arith.constant 0 : i32
    %c0_i32_1 = arith.constant 0 : i32
    return %c0_i32, %c0_i32_0 : i32, i32
  }
  func.func @transform_4(%arg0: i32) -> (i32, i32) {
    %c0_i32 = arith.constant 0 : i32
    %c0_i32_0 = arith.constant 0 : i32
    %c0_i32_1 = arith.constant 0 : i32
    return %c0_i32, %c0_i32_0 : i32, i32
  }
  func.func @transform_5(%arg0: i32) -> (i32, i32) {
    %c0_i32 = arith.constant 0 : i32
    %c0_i32_0 = arith.constant 0 : i32
    %c0_i32_1 = arith.constant 0 : i32
    return %c0_i32, %c0_i32_0 : i32, i32
  }
  func.func @transform_6(%arg0: i32) -> (i32, i32, i32) {
    %c0_i32 = arith.constant 0 : i32
    %c0_i32_0 = arith.constant 0 : i32
    %c0_i32_1 = arith.constant 0 : i32
    return %arg0, %c0_i32, %c0_i32_0 : i32, i32, i32
  }
}

</mosaic_0001>

<bundles_post_ra>
// kernel: tpu_custom_call.1
= control target key start
LH: loop header
LB: loop body
LE: loop exit
PB: predicated region body
PF: predicated region fallthrough
CT: control target
= control target key end

     0   :  { %11 = vsyncpa [#allocation3], 0  ;;  %s2607_s0 = inlined_call_operand.vmem [shape: s32[1,128,1], index: 0, kind: input, shape index: {}]   ;;  %s2608_s1 = inlined_call_operand.vmem [shape: bf16[128,128], index: 1, kind: input, shape index: {}]   ;;  %s2609_s2 = inlined_call_operand.hbm [shape: bf16[384,128], index: 2, kind: input, shape index: {}]   ;;  %s2610_s3 = inlined_call_operand.vmem [shape: f32[1,128], index: 3, kind: input, shape index: {}]   ;;  %s2611_s4 = inlined_call_operand.hbm [shape: bf16[384,128], index: 4, kind: input, shape index: {}]   ;;  %s2612_s5 = inlined_call_operand.vmem [shape: f32[1,128], index: 5, kind: input, shape index: {}]   ;;  %s2613_s6 = inlined_call_operand.hbm [shape: f32[1,2,128], index: 6, kind: output, shape index: {}]  }
   0x1   :  { %12 = vsyncpa [#allocation6], 0 }
   0x2   :  { %13 = vsyncpa [#allocation4], 0  ;;  %s2083_s21 = smov [#allocation2]   ;;  %s2011_s25 = scalar_lea.hbm %s2609_s2, 3072 }
   0x3   :  { %s23_s22 = sshll.u32 %s2083_s21, 4  ;;  %p2012_p0 = scmp.ne.s32.totalorder %s2609_s2, %s2011_s25  ;;  %s24_s22 = int_to_ptr.vmem [resolvable:$true] %s23_s22 }
   0x4   :  { %p2015_p1 = scmp.lt.u32.totalorder %s2011_s25, %s2609_s2 }
   0x6   :  { %p2017_p2 = pnand %p2015_p1, %p2012_p0 }
   0x8   :  { %2020 = shalt.err (!%p2017_p2)
}
   0x9   :  { %s2021_s30 = scalar_lea.vmem %s24_s22, 3072  ;;  %p2026_p4 = scmp.lt.s32.totalorder %s24_s22, %s24_s22 }
   0xa   :  { %p2022_p3 = scmp.ne.s32.totalorder %s24_s22, %s2021_s30  ;;  %p2027_p5 = scmp.lt.s32.totalorder %s2021_s30, %s2021_s30 }
   0xc   :  { %p2028_p6 = por %p2027_p5, %p2026_p4 }
   0xe   :  { %p2029_p7 = pnand %p2028_p6, %p2022_p3 }
  0x10   :  { %2032 = shalt.err (!%p2029_p7)
}
  0x11   :  { %s2084_s7 = smov 64   ;;  %s2085_s8 = smov 4  }
  0x12   :  { %29 = dma.hbm_to_vmem [thread:$0]  %s2609_s2, 3072, %s24_s22, [#allocation3], %s2084_s7, %s2084_s7, %s2085_s8  }
  0x13   :  { %s2086_s11 = smov [#allocation5]   ;;  %s2033_s15 = scalar_lea.hbm %s2611_s4, 3072 }
  0x14   :  { %s37_s12 = sshll.u32 %s2086_s11, 4  ;;  %p2034_p8 = scmp.ne.s32.totalorder %s2611_s4, %s2033_s15  ;;  %s38_s12 = int_to_ptr.vmem [resolvable:$true] %s37_s12 }
  0x15   :  { %p2037_p9 = scmp.lt.u32.totalorder %s2033_s15, %s2611_s4 }
  0x17   :  { %p2039_p10 = pnand %p2037_p9, %p2034_p8 }
  0x19   :  { %2042 = shalt.err (!%p2039_p10)
}
  0x1a   :  { %s2043_s20 = scalar_lea.vmem %s38_s12, 3072  ;;  %p2048_p12 = scmp.lt.s32.totalorder %s38_s12, %s38_s12 }
  0x1b   :  { %p2044_p11 = scmp.ne.s32.totalorder %s38_s12, %s2043_s20  ;;  %p2049_p13 = scmp.lt.s32.totalorder %s2043_s20, %s2043_s20 }
  0x1d   :  { %p2050_p0 = por %p2049_p13, %p2048_p12 }
  0x1f   :  { %p2051_p1 = pnand %p2050_p0, %p2044_p11 }
  0x21   :  { %2054 = shalt.err (!%p2051_p1)
}
  0x22   :  { %43 = dma.hbm_to_vmem [thread:$0]  %s2611_s4, 3072, %s38_s12, [#allocation6], %s2084_s7, %s2084_s7, %s2085_s8  }
  0x23   :  { %2077 = dma.done.wait [#allocation3], 3072  }
  0x24   :  { %2078 = vsyncadd [#allocation3], 4294964224 }
  0x25   :  { %2079 = dma.done.wait [#allocation6], 3072  }
  0x26   :  { %2080 = vsyncadd [#allocation6], 4294964224  ;;  %v2087_v0 = vmov 0   ;;  %v55_v1 = vld [vmem:[%s2607_s0 + $0x10] sm:$0xff]  ;;  %v53_v2 = vld [vmem:[%s2607_s0] sm:$0xff]  ;;  %v69_v38 = vlaneseq }
  0x27   :  { %1954 = vset.pattern.permute.xlu1 %v2087_v0  ;;  %1953 = vset.pattern.permute.xlu0 %v2087_v0  ;;  %v56_v3 = vld [vmem:[%s2607_s0 + $0x18] sm:$0xff]  ;;  %v54_v4 = vld [vmem:[%s2607_s0 + $0x8] sm:$0xff]  ;;  %v57_v6 = vld [vmem:[%s2607_s0 + $0x20] sm:$0xff]  ;;  %v2088_v45 = vmov 1.0|1.0  }
  0x28   :  { %78 = vperm.xlu1 %1954, %v55_v1   ;;  %72 = vperm.xlu0 %1953, %v53_v2   ;;  %v58_v5 = vld [vmem:[%s2607_s0 + $0x28] sm:$0xff]  ;;  %v1955_v7 = vld [vmem:[%s2608_s1] sm:$0xff]   ;;  %v60_v9 = vld [vmem:[%s2607_s0 + $0x38] sm:$0xff]  ;;  %v70_v41 = vand.u32 127, %v69_v38 }
  0x29   :  { %v1956_v8 = vld [vmem:[%s2608_s1 + $0x8] sm:$0xff]   ;;  %1849 = vmatprep.subr.bf16.mxu0 %v1955_v7  ;;  %v59_v10 = vld [vmem:[%s2607_s0 + $0x30] sm:$0xff]  ;;  %v61_v13 = vld [vmem:[%s2607_s0 + $0x40] sm:$0xff] }
  0x2a   :  { %1850 = vmatpush3.bf16.msra.mxu0 %v1955_v7  ;;  %v1957_v11 = vld [vmem:[%s2608_s1 + $0x10] sm:$0xff]   ;;  %v62_v12 = vld [vmem:[%s2607_s0 + $0x48] sm:$0xff]  ;;  %v1958_v14 = vld [vmem:[%s2608_s1 + $0x18] sm:$0xff]  }
  0x2b   :  { %1851 = vmatprep.subr.bf16.mxu0 %v1956_v8  ;;  %v64_v15 = vld [vmem:[%s2607_s0 + $0x58] sm:$0xff]  ;;  %v63_v16 = vld [vmem:[%s2607_s0 + $0x50] sm:$0xff]  ;;  %v1959_v17 = vld [vmem:[%s2608_s1 + $0x20] sm:$0xff]  }
  0x2c   :  { %81 = vperm.xlu1 %1954, %v56_v3   ;;  %75 = vperm.xlu0 %1953, %v54_v4   ;;  %v66_v18 = vld [vmem:[%s2607_s0 + $0x68] sm:$0xff]  ;;  %v65_v19 = vld [vmem:[%s2607_s0 + $0x60] sm:$0xff]  ;;  %v68_v21 = vld [vmem:[%s2607_s0 + $0x78] sm:$0xff] }
  0x2d   :  { %v1960_v20 = vld [vmem:[%s2608_s1 + $0x28] sm:$0xff]   ;;  %v67_v22 = vld [vmem:[%s2607_s0 + $0x70] sm:$0xff]  ;;  %v1962_v24 = vld [vmem:[%s2608_s1 + $0x38] sm:$0xff]  }
  0x2e   :  { %1852 = vmatpush3.bf16.msra.mxu0 %v1956_v8  ;;  %v1961_v23 = vld [vmem:[%s2608_s1 + $0x30] sm:$0xff]   ;;  %v1963_v25 = vld [vmem:[#allocation2 + $0x40] sm:$0xff]   ;;  %v1965_v27 = vld [vmem:[#allocation2 + $0x48] sm:$0xff]  }
  0x2f   :  { %1853 = vmatprep.subr.bf16.mxu0 %v1957_v11  ;;  %v1964_v26 = vld [vmem:[#allocation2] sm:$0xff]   ;;  %1689 = vmatprep.subr.bf16.mxu1 %v1963_v25  ;;  %v1966_v29 = vld [vmem:[#allocation2 + $0x8] sm:$0xff]   ;;  %v1968_v30 = vld [vmem:[#allocation2 + $0x50] sm:$0xff]  }
  0x30   :  { %87 = vperm.xlu1 %1954, %v58_v5   ;;  %84 = vperm.xlu0 %1953, %v57_v6   ;;  %v1967_v28 = vld [vmem:[#allocation2 + $0x80] sm:$0xff]   ;;  %v1969_v31 = vld [vmem:[#allocation2 + $0x10] sm:$0xff]   ;;  %v1971_v32 = vld [vmem:[#allocation2 + $0x58] sm:$0xff]   ;;  %v2224_v6 = vshrl.u32 %v69_v38, 7 }
  0x31   :  { %1690 = vmatpush3.bf16.msra.mxu1 %v1964_v26  ;;  %v1972_v33 = vld [vmem:[#allocation2 + $0x18] sm:$0xff]   ;;  %v1974_v34 = vld [vmem:[#allocation2 + $0x60] sm:$0xff]   ;;  %v1977_v36 = vld [vmem:[#allocation2 + $0x68] sm:$0xff]  }
  0x32   :  { %1854 = vmatpush3.bf16.msra.mxu0 %v1957_v11  ;;  %1691 = vmatprep.subr.bf16.mxu1 %v1965_v27  ;;  %v1975_v35 = vld [vmem:[#allocation2 + $0x20] sm:$0xff]   ;;  %v1978_v37 = vld [vmem:[#allocation2 + $0x28] sm:$0xff]   ;;  %v1973_v48 = vld [vmem:[#allocation2 + $0x90] sm:$0xff]  }
  0x33   :  { %1855 = vmatprep.subr.bf16.mxu0 %v1958_v14  ;;  %v1970_v44 = vld [vmem:[#allocation2 + $0x88] sm:$0xff]   ;;  %v1976_v51 = vld [vmem:[#allocation2 + $0x98] sm:$0xff]   ;;  %v1979_v54 = vld [vmem:[#allocation2 + $0xa0] sm:$0xff]  }
  0x34   :  { %93 = vperm.xlu1 %1954, %v60_v9   ;;  %90 = vperm.xlu0 %1953, %v59_v10   ;;  %v1980_v61 = vld [vmem:[#allocation2 + $0x70] sm:$0xff]   ;;  %v1982_v63 = vld [vmem:[#allocation2 + $0xa8] sm:$0xff]   ;;  %v1983_v0 = vld [vmem:[#allocation2 + $0x78] sm:$0xff]  }
  0x35   :  { %1692 = vmatpush3.bf16.msra.mxu1 %v1966_v29  ;;  %v1981_v62 = vld [vmem:[#allocation2 + $0x30] sm:$0xff]   ;;  %v1984_v1 = vld [vmem:[#allocation2 + $0x38] sm:$0xff]   ;;  %v1987_v4 = vld [vmem:[#allocation5 + $0x40] sm:$0xff]  }
  0x36   :  { %1856 = vmatpush3.bf16.msra.mxu0 %v1958_v14  ;;  %1693 = vmatprep.subr.bf16.mxu1 %v1968_v30  ;;  %v1985_v2 = vld [vmem:[#allocation2 + $0xb0] sm:$0xff]   ;;  %v1986_v3 = vld [vmem:[#allocation2 + $0xb8] sm:$0xff]   ;;  %v1989_v5 = vld [vmem:[#allocation5 + $0x80] sm:$0xff]  }
  0x37   :  { %1857 = vmatprep.subr.bf16.mxu0 %v1959_v17 }
  0x38   :  { %99 = vperm.xlu1 %1954, %v62_v12   ;;  %96 = vperm.xlu0 %1953, %v61_v13  }
  0x39   :  { %1694 = vmatpush3.bf16.msra.mxu1 %v1969_v31 }
  0x3a   :  { %1858 = vmatpush3.bf16.msra.mxu0 %v1959_v17  ;;  %1695 = vmatprep.subr.bf16.mxu1 %v1971_v32 }
  0x3b   :  { %1859 = vmatprep.subr.bf16.mxu0 %v1960_v20 }
  0x3c   :  { %105 = vperm.xlu1 %1954, %v64_v15   ;;  %102 = vperm.xlu0 %1953, %v63_v16  }
  0x3d   :  { %1696 = vmatpush3.bf16.msra.mxu1 %v1972_v33 }
  0x3e   :  { %1860 = vmatpush3.bf16.msra.mxu0 %v1960_v20  ;;  %1697 = vmatprep.subr.bf16.mxu1 %v1974_v34 }
  0x3f   :  { %1861 = vmatprep.subr.bf16.mxu0 %v1961_v23 }
  0x40   :  { %111 = vperm.xlu1 %1954, %v66_v18   ;;  %108 = vperm.xlu0 %1953, %v65_v19  }
  0x41   :  { %1698 = vmatpush3.bf16.msra.mxu1 %v1975_v35 }
  0x42   :  { %1862 = vmatpush3.bf16.msra.mxu0 %v1961_v23  ;;  %1699 = vmatprep.subr.bf16.mxu1 %v1977_v36 }
  0x43   :  { %1863 = vmatprep.subr.bf16.mxu0 %v1962_v24 }
  0x44   :  { %117 = vperm.xlu1 %1954, %v68_v21   ;;  %114 = vperm.xlu0 %1953, %v67_v22  }
  0x45   :  { %1700 = vmatpush3.bf16.msra.mxu1 %v1978_v37 }
  0x46   :  { %1864 = vmatpush3.bf16.msra.mxu0 %v1962_v24  ;;  %1701 = vmatprep.subr.bf16.mxu1 %v1980_v61 }
  0x47   :  { %1881 = vmatprep.subr.bf16.mxu0 %v1967_v28 }
  0x49   :  { %1702 = vmatpush3.bf16.msra.mxu1 %v1981_v62 }
  0x4a   :  { %1703 = vmatprep.subr.bf16.mxu1 %v1983_v0 }
  0x4d   :  { %1704 = vmatpush3.bf16.msra.mxu1 %v1984_v1 }
  0x4e   :  { %1913 = vmatprep.subr.bf16.mxu1 %v1989_v5 }
  0xa7   :  { %v79_v39 = vpop.permute.xlu1 %78  ;;  %v73_v40 = vpop.permute.xlu0 %72 }
  0xa8   :  { %vm121_vm0 = vcmp.eq.s32.totalorder %v79_v39, %v70_v41  ;;  %vm119_vm3 = vcmp.eq.s32.totalorder %v73_v40, %v70_v41 }
  0xab   :  { %v82_v42 = vpop.permute.xlu1 %81  ;;  %v76_v43 = vpop.permute.xlu0 %75 }
  0xac   :  { %vm122_vm1 = vcmp.eq.s32.totalorder %v82_v42, %v70_v41  ;;  %vm120_vm2 = vcmp.eq.s32.totalorder %v76_v43, %v70_v41 }
  0xad   :  { %vm1609_vm4 = vmpackc.low %vm122_vm1, %vm121_vm0 }
  0xae   :  { %vm1607_vm5 = vmpackc.low %vm120_vm2, %vm119_vm3 }
  0xaf   :  { %1865 = vmatprep.mubr.msk.bf16.mxu0 %vm1607_vm5, %v2088_v45  ;;  %v88_v46 = vpop.permute.xlu1 %87  ;;  %v85_v47 = vpop.permute.xlu0 %84 }
  0xb0   :  { %vm124_vm6 = vcmp.eq.s32.totalorder %v88_v46, %v70_v41  ;;  %1866 = vmatmul.mubr.msk.bf16.vlgmr.msra.gmra.mrb[0].mxu0 %vm1609_vm4, %v2088_v45  ;;  %vm123_vm7 = vcmp.eq.s32.totalorder %v85_v47, %v70_v41 }
  0xb1   :  { %vm1611_vm8 = vmpackc.low %vm124_vm6, %vm123_vm7  ;;  %1882 = vmatpush3.bf16.msra.mxu0 %v1967_v28 }
  0xb2   :  { %1869 = vmatprep.mubr.msk.bf16.mxu0 %vm1611_vm8, %v2088_v45  ;;  %1883 = vmatprep.subr.bf16.mxu0 %v1970_v44  ;;  %vm354_vm8 = vcmp.lt.s32.totalorder %v2224_v6, 7 }
  0xb3   :  { %v94_v49 = vpop.permute.xlu1 %93  ;;  %v91_v50 = vpop.permute.xlu0 %90 }
  0xb4   :  { %vm126_vm9 = vcmp.eq.s32.totalorder %v94_v49, %v70_v41  ;;  %vm125_vm10 = vcmp.eq.s32.totalorder %v91_v50, %v70_v41  ;;  %v1990_v49 = vld [vmem:[#allocation5 + $0x48] sm:$0xff]  }
  0xb5   :  { %vm1613_vm11 = vmpackc.low %vm126_vm9, %vm125_vm10  ;;  %1884 = vmatpush3.bf16.msra.mxu0 %v1970_v44  ;;  %vm387_vm9 = vcmp.lt.s32.totalorder %v2224_v6, 6  ;;  %v1988_v44 = vld [vmem:[#allocation5] sm:$0xff]  }
  0xb6   :  { %1885 = vmatprep.subr.bf16.mxu0 %v1973_v48 }
  0xb7   :  { %v100_v52 = vpop.permute.xlu1 %99  ;;  %v97_v53 = vpop.permute.xlu0 %96 }
  0xb8   :  { %vm128_vm12 = vcmp.eq.s32.totalorder %v100_v52, %v70_v41  ;;  %1870 = vmatmul.mubr.msk.bf16.gmra.mrb[4].mxu0 %vm1613_vm11, %v2088_v45  ;;  %vm127_vm13 = vcmp.eq.s32.totalorder %v97_v53, %v70_v41 }
  0xb9   :  { %vm1615_vm14 = vmpackc.low %vm128_vm12, %vm127_vm13  ;;  %1886 = vmatpush3.bf16.msra.mxu0 %v1973_v48 }
  0xba   :  { %1873 = vmatprep.mubr.msk.bf16.mxu0 %vm1615_vm14, %v2088_v45  ;;  %1887 = vmatprep.subr.bf16.mxu0 %v1976_v51 }
  0xbb   :  { %v106_v55 = vpop.permute.xlu1 %105  ;;  %v103_v56 = vpop.permute.xlu0 %102 }
  0xbc   :  { %vm130_vm15 = vcmp.eq.s32.totalorder %v106_v55, %v70_v41  ;;  %vm129_vm0 = vcmp.eq.s32.totalorder %v103_v56, %v70_v41 }
  0xbd   :  { %vm1617_vm1 = vmpackc.low %vm130_vm15, %vm129_vm0  ;;  %1888 = vmatpush3.bf16.msra.mxu0 %v1976_v51 }
  0xbe   :  { %1889 = vmatprep.subr.bf16.mxu0 %v1979_v54 }
  0xbf   :  { %v112_v57 = vpop.permute.xlu1 %111  ;;  %v109_v58 = vpop.permute.xlu0 %108 }
  0xc0   :  { %vm132_vm2 = vcmp.eq.s32.totalorder %v112_v57, %v70_v41  ;;  %1874 = vmatmul.mubr.msk.bf16.gmra.mrb[8].mxu0 %vm1617_vm1, %v2088_v45  ;;  %vm131_vm3 = vcmp.eq.s32.totalorder %v109_v58, %v70_v41  ;;  %v1991_v58 = vld [vmem:[#allocation5 + $0x8] sm:$0xff]  }
  0xc1   :  { %vm1619_vm4 = vmpackc.low %vm132_vm2, %vm131_vm3  ;;  %1890 = vmatpush3.bf16.msra.mxu0 %v1979_v54 }
  0xc2   :  { %1877 = vmatprep.mubr.msk.bf16.mxu0 %vm1619_vm4, %v2088_v45  ;;  %1891 = vmatprep.subr.bf16.mxu0 %v1982_v63 }
  0xc3   :  { %v118_v59 = vpop.permute.xlu1 %117  ;;  %v115_v60 = vpop.permute.xlu0 %114 }
  0xc4   :  { %vm134_vm5 = vcmp.eq.s32.totalorder %v118_v59, %v70_v41  ;;  %vm133_vm6 = vcmp.eq.s32.totalorder %v115_v60, %v70_v41 }
  0xc5   :  { %vm1621_vm7 = vmpackc.low %vm134_vm5, %vm133_vm6  ;;  %1892 = vmatpush3.bf16.msra.mxu0 %v1982_v63 }
  0xc6   :  { %1893 = vmatprep.subr.bf16.mxu0 %v1985_v2 }
  0xc8   :  { %1878 = vmatmul.mubr.msk.bf16.gmra.mrb[12].mxu0 %vm1621_vm7, %v2088_v45 }
  0xc9   :  { %1894 = vmatpush3.bf16.msra.mxu0 %v1985_v2 }
  0xca   :  { %1895 = vmatprep.subr.bf16.mxu0 %v1986_v3 }
  0xcd   :  { %1896 = vmatpush3.bf16.msra.mxu0 %v1986_v3 }
  0xce   :  { %1769 = vmatprep.subr.bf16.mxu0 %v1987_v4 }
 0x183   :  { %v2226_v7 = vpop.f32.mrb[0].mxu0 }
 0x184   :  { %v2228_v8 = vpop.f32.mrb[1].mxu0  ;;  %v338_v9 = vrot.slane %v2226_v7, 1  ;;  %v373_v10 = vrot.slane %v2226_v7, 2 }
 0x185   :  { %v1868_v11 = vpop.f32.mrb[2].mxu0  ;;  %v336_v12 = vrot.slane %v2228_v8, 1  ;;  %v371_v17 = vrot.slane %v2228_v8, 2 }
 0x186   :  { %v339_v13 = vrot.slane %v1868_v11, 1  ;;  %v374_v14 = vrot.slane %v1868_v11, 2  ;;  %v407_v15 = vpack.c.bf16 %v1868_v11, %v2226_v7  ;;  %v276_v16 = vpop.f32.mrb[3].mxu0 }
 0x187   :  { %v337_v18 = vrot.slane %v276_v16, 1  ;;  %v372_v19 = vrot.slane %v276_v16, 2  ;;  %v404_v20 = vpack.c.bf16 %v276_v16, %v2228_v8  ;;  %v1993_v8 = vld [vmem:[#allocation5 + $0x10] sm:$0xff]  }
 0x188   :  { %v400_v21 = vsel %vm387_vm9, %v373_v10, %v374_v14  ;;  %v367_v22 = vsel %vm354_vm8, %v338_v9, %v339_v13 }
 0x189   :  { %v368_v23 = vsel %vm354_vm8, %v337_v18, %v338_v9  ;;  %v369_v24 = vsel %vm354_vm8, %v336_v12, %v337_v18  ;;  %v401_v25 = vsel %vm387_vm9, %v372_v19, %v373_v10  ;;  %v402_v26 = vsel %vm387_vm9, %v371_v17, %v372_v19 }
 0x18a   :  { %v405_v27 = vpack.c.bf16 %v368_v23, %v369_v24  ;;  %v406_v28 = vpack.c.bf16 %v401_v25, %v402_v26 }
 0x18b   :  { %v2254_v29 = vpop.f32.mrb[4].mxu0 }
 0x18c   :  { %v2256_v30 = vpop.f32.mrb[5].mxu0  ;;  %659 = vmatprep.mubr.bf16.mxu1 %v405_v27  ;;  %1897 = vmatprep.mubr.bf16.mxu0 %v406_v28  ;;  %v342_v31 = vrot.slane %v2254_v29, 1  ;;  %v377_v35 = vrot.slane %v2254_v29, 2 }
 0x18d   :  { %v340_v32 = vrot.slane %v2256_v30, 1  ;;  %v375_v33 = vrot.slane %v2256_v30, 2  ;;  %v2261_v34 = vpop.f32.mrb[6].mxu0  ;;  %660 = vmatmul.mubr.bf16.vlgmr.msra.gmra.mrb[0].mxu1 %v404_v20 }
 0x18e   :  { %v343_v36 = vrot.slane %v2261_v34, 1  ;;  %v378_v37 = vrot.slane %v2261_v34, 2  ;;  %v413_v38 = vpack.c.bf16 %v2261_v34, %v2254_v29  ;;  %v292_v39 = vpop.f32.mrb[7].mxu0  ;;  %1914 = vmatpush3.bf16.msra.mxu1 %v1989_v5  ;;  %v1998_v29 = vld [vmem:[#allocation5 + $0x90] sm:$0xff]   ;;  %v1997_v34 = vld [vmem:[#allocation5 + $0x60] sm:$0xff]  }
 0x18f   :  { %v399_v40 = vsel %vm387_vm9, %v374_v14, %v375_v33  ;;  %v341_v41 = vrot.slane %v292_v39, 1  ;;  %v376_v42 = vrot.slane %v292_v39, 2  ;;  %v410_v43 = vpack.c.bf16 %v292_v39, %v2256_v30 }
 0x190   :  { %v409_v45 = vpack.c.bf16 %v399_v40, %v400_v21  ;;  %v366_v46 = vsel %vm354_vm8, %v339_v13, %v340_v32  ;;  %v396_v47 = vsel %vm387_vm9, %v377_v35, %v378_v37  ;;  %v363_v48 = vsel %vm354_vm8, %v342_v31, %v343_v36 }
 0x191   :  { %v408_v50 = vpack.c.bf16 %v366_v46, %v367_v22  ;;  %v397_v51 = vsel %vm387_vm9, %v376_v42, %v377_v35  ;;  %v398_v52 = vsel %vm387_vm9, %v375_v33, %v376_v42  ;;  %v364_v53 = vsel %vm354_vm8, %v341_v41, %v342_v31 }
 0x192   :  { %1898 = vmatmul.mubr.bf16.vlgmr.msra.gmra.mrb[16].mxu0 %v409_v45  ;;  %v412_v54 = vpack.c.bf16 %v397_v51, %v398_v52  ;;  %v365_v55 = vsel %vm354_vm8, %v340_v32, %v341_v41 }
 0x193   :  { %667 = vmatprep.mubr.bf16.mxu1 %v408_v50  ;;  %v2285_v56 = vpop.f32.mrb[8].mxu0  ;;  %v411_v57 = vpack.c.bf16 %v364_v53, %v365_v55  ;;  %1770 = vmatpush3.bf16.msra.mxu0 %v1988_v44 }
 0x194   :  { %v2287_v59 = vpop.f32.mrb[9].mxu0  ;;  %1901 = vmatprep.mubr.bf16.mxu0 %v412_v54  ;;  %1771 = vmatprep.subr.bf16.mxu0 %v1990_v49  ;;  %v346_v60 = vrot.slane %v2285_v56, 1  ;;  %v381_v0 = vrot.slane %v2285_v56, 2 }
 0x195   :  { %v344_v61 = vrot.slane %v2287_v59, 1  ;;  %v379_v62 = vrot.slane %v2287_v59, 2  ;;  %v2292_v63 = vpop.f32.mrb[10].mxu0  ;;  %668 = vmatmul.mubr.bf16.gmra.mrb[4].mxu1 %v407_v15 }
 0x196   :  { %v347_v1 = vrot.slane %v2292_v63, 1  ;;  %v382_v2 = vrot.slane %v2292_v63, 2  ;;  %v419_v3 = vpack.c.bf16 %v2292_v63, %v2285_v56  ;;  %v308_v4 = vpop.f32.mrb[11].mxu0  ;;  %675 = vmatprep.mubr.bf16.mxu1 %v411_v57  ;;  %v1992_v56 = vld [vmem:[#allocation5 + $0x50] sm:$0xff]   ;;  %v1994_v57 = vld [vmem:[#allocation5 + $0x88] sm:$0xff]  }
 0x197   :  { %v345_v5 = vrot.slane %v308_v4, 1  ;;  %v380_v7 = vrot.slane %v308_v4, 2  ;;  %v416_v9 = vpack.c.bf16 %v308_v4, %v2287_v59  ;;  %v395_v10 = vsel %vm387_vm9, %v378_v37, %v379_v62  ;;  %1772 = vmatpush3.bf16.msra.mxu0 %v1991_v58  ;;  %1915 = vmatprep.subr.bf16.mxu1 %v1994_v57  ;;  %v1996_v58 = vld [vmem:[#allocation5 + $0x18] sm:$0xff]   ;;  %v2003_v63 = vld [vmem:[#allocation5 + $0x70] sm:$0xff]  }
 0x198   :  { %v415_v11 = vpack.c.bf16 %v395_v10, %v396_v47  ;;  %v362_v13 = vsel %vm354_vm8, %v343_v36, %v344_v61  ;;  %v392_v14 = vsel %vm387_vm9, %v381_v0, %v382_v2  ;;  %v359_v15 = vsel %vm354_vm8, %v346_v60, %v347_v1  ;;  %1773 = vmatprep.subr.bf16.mxu0 %v1992_v56  ;;  %v2001_v59 = vld [vmem:[#allocation5 + $0x98] sm:$0xff]   ;;  %v2009_v4 = vld [vmem:[#allocation5 + $0xb0] sm:$0xff]   ;;  %v2346_v10 = vld [vmem:[%s2610_s3] ss:$0 sm:$0xff] }
 0x199   :  { %v393_v16 = vsel %vm387_vm9, %v380_v7, %v381_v0  ;;  %v394_v18 = vsel %vm387_vm9, %v379_v62, %v380_v7  ;;  %v414_v19 = vpack.c.bf16 %v362_v13, %v363_v48  ;;  %v360_v20 = vsel %vm354_vm8, %v345_v5, %v346_v60  ;;  %1916 = vmatpush3.bf16.msra.mxu1 %v1994_v57  ;;  %v2000_v60 = vld [vmem:[#allocation5 + $0x68] sm:$0xff]   ;;  %v2004_v62 = vld [vmem:[#allocation5 + $0xa0] sm:$0xff]   ;;  %v2005_v0 = vld [vmem:[#allocation5 + $0x30] sm:$0xff]  }
 0x19a   :  { %1902 = vmatmul.mubr.bf16.gmra.mrb[20].mxu0 %v415_v11  ;;  %v418_v21 = vpack.c.bf16 %v393_v16, %v394_v18  ;;  %v361_v22 = vsel %vm354_vm8, %v344_v61, %v345_v5  ;;  %1917 = vmatprep.subr.bf16.mxu1 %v1998_v29  ;;  %v2002_v61 = vld [vmem:[#allocation5 + $0x28] sm:$0xff]   ;;  %v2010_v5 = vld [vmem:[#allocation5 + $0xb8] sm:$0xff]  }
 0x19b   :  { %v1879_v23 = vpop.f32.mrb[12].mxu0  ;;  %v417_v24 = vpack.c.bf16 %v360_v20, %v361_v22  ;;  %1774 = vmatpush3.bf16.msra.mxu0 %v1993_v8 }
 0x19c   :  { %v321_v25 = vpop.f32.mrb[13].mxu0  ;;  %1905 = vmatprep.mubr.bf16.mxu0 %v418_v21  ;;  %v350_v26 = vrot.slane %v1879_v23, 1  ;;  %v385_v31 = vrot.slane %v1879_v23, 2 }
 0x19d   :  { %v348_v27 = vrot.slane %v321_v25, 1  ;;  %v383_v28 = vrot.slane %v321_v25, 2  ;;  %v1880_v30 = vpop.f32.mrb[14].mxu0  ;;  %676 = vmatmul.mubr.bf16.gmra.mrb[8].mxu1 %v410_v43 }
 0x19e   :  { %v351_v32 = vrot.slane %v1880_v30, 1  ;;  %v386_v33 = vrot.slane %v1880_v30, 2  ;;  %v425_v35 = vpack.c.bf16 %v1880_v30, %v1879_v23  ;;  %v324_v36 = vpop.f32.mrb[15].mxu0  ;;  %683 = vmatprep.mubr.bf16.mxu1 %v414_v19  ;;  %1918 = vmatpush3.bf16.msra.mxu1 %v1998_v29 }
 0x19f   :  { %v349_v37 = vrot.slane %v324_v36, 1  ;;  %v384_v39 = vrot.slane %v324_v36, 2  ;;  %v422_v40 = vpack.c.bf16 %v324_v36, %v321_v25  ;;  %v391_v41 = vsel %vm387_vm9, %v382_v2, %v383_v28  ;;  %1919 = vmatprep.subr.bf16.mxu1 %v2001_v59  ;;  %v2006_v2 = vld [vmem:[#allocation5 + $0x78] sm:$0xff]  }
 0x1a0   :  { %v421_v42 = vpack.c.bf16 %v391_v41, %v392_v14  ;;  %v388_v44 = vsel %vm387_vm9, %v385_v31, %v386_v33  ;;  %v403_v43 = vsel %vm387_vm9, %v386_v33, %v371_v17  ;;  %v358_v45 = vsel %vm354_vm8, %v347_v1, %v348_v27  ;;  %v2007_v1 = vld [vmem:[#allocation5 + $0xa8] sm:$0xff]  }
 0x1a1   :  { %v389_v46 = vsel %vm387_vm9, %v384_v39, %v385_v31  ;;  %v390_v47 = vsel %vm387_vm9, %v383_v28, %v384_v39  ;;  %v427_v48 = vpack.c.bf16 %v403_v43, %v388_v44  ;;  %v420_v49 = vpack.c.bf16 %v358_v45, %v359_v15 }
 0x1a2   :  { %1906 = vmatmul.mubr.bf16.gmra.mrb[24].mxu0 %v421_v42  ;;  %v424_v50 = vpack.c.bf16 %v389_v46, %v390_v47  ;;  %v356_v51 = vsel %vm354_vm8, %v349_v37, %v350_v26  ;;  %v357_v52 = vsel %vm354_vm8, %v348_v27, %v349_v37  ;;  %v355_v17 = vsel %vm354_vm8, %v350_v26, %v351_v32 }
 0x1a3   :  { %v423_v53 = vpack.c.bf16 %v356_v51, %v357_v52  ;;  %v370_v54 = vsel %vm354_vm8, %v351_v32, %v336_v12  ;;  %v1995_v12 = vld [vmem:[#allocation5 + $0x58] sm:$0xff]   ;;  %1920 = vmatpush3.bf16.msra.mxu1 %v2001_v59 }
 0x1a4   :  { %1909 = vmatprep.mubr.bf16.mxu0 %v424_v50  ;;  %v426_v55 = vpack.c.bf16 %v370_v54, %v355_v17  ;;  %1775 = vmatprep.subr.bf16.mxu0 %v1995_v12 }
 0x1a5   :  { %684 = vmatmul.mubr.bf16.gmra.mrb[12].mxu1 %v413_v38  ;;  %1776 = vmatpush3.bf16.msra.mxu0 %v1996_v58  ;;  %v1999_v38 = vld [vmem:[#allocation5 + $0x20] sm:$0xff]  }
 0x1a6   :  { %691 = vmatprep.mubr.bf16.mxu1 %v417_v24  ;;  %1777 = vmatprep.subr.bf16.mxu0 %v1997_v34 }
 0x1a7   :  { %1921 = vmatprep.subr.bf16.mxu1 %v2004_v62 }
 0x1a8   :  { %1922 = vmatpush3.bf16.msra.mxu1 %v2004_v62 }
 0x1a9   :  { %1778 = vmatpush3.bf16.msra.mxu0 %v1999_v38  ;;  %1923 = vmatprep.subr.bf16.mxu1 %v2007_v1 }
 0x1aa   :  { %1910 = vmatmul.mubr.bf16.gmra.mrb[28].mxu0 %v427_v48  ;;  %1779 = vmatprep.subr.bf16.mxu0 %v2000_v60 }
 0x1ac   :  { %1924 = vmatpush3.bf16.msra.mxu1 %v2007_v1 }
 0x1ad   :  { %692 = vmatmul.mubr.bf16.gmra.mrb[16].mxu1 %v416_v9  ;;  %1780 = vmatpush3.bf16.msra.mxu0 %v2002_v61 }
 0x1ae   :  { %699 = vmatprep.mubr.bf16.mxu1 %v420_v49  ;;  %1781 = vmatprep.subr.bf16.mxu0 %v2003_v63 }
 0x1af   :  { %1925 = vmatprep.subr.bf16.mxu1 %v2009_v4 }
 0x1b0   :  { %1926 = vmatpush3.bf16.msra.mxu1 %v2009_v4 }
 0x1b1   :  { %1782 = vmatpush3.bf16.msra.mxu0 %v2005_v0  ;;  %1927 = vmatprep.subr.bf16.mxu1 %v2010_v5 }
 0x1b2   :  { %1783 = vmatprep.subr.bf16.mxu0 %v2006_v2 }
 0x1b4   :  { %1928 = vmatpush3.bf16.msra.mxu1 %v2010_v5 }
 0x1b5   :  { %700 = vmatmul.mubr.bf16.gmra.mrb[20].mxu1 %v419_v3  ;;  %v2008_v3 = vld [vmem:[#allocation5 + $0x38] sm:$0xff]  }
 0x1b6   :  { %707 = vmatprep.mubr.bf16.mxu1 %v423_v53  ;;  %1784 = vmatpush3.bf16.msra.mxu0 %v2008_v3 }
 0x1bd   :  { %708 = vmatmul.mubr.bf16.gmra.mrb[24].mxu1 %v422_v40 }
 0x1be   :  { %715 = vmatprep.mubr.bf16.mxu1 %v426_v55 }
 0x1c5   :  { %716 = vmatmul.mubr.bf16.gmra.mrb[28].mxu1 %v425_v35 }
 0x260   :  { %v1705_v7 = vpop.f32.mrb[0].mxu1 }
 0x261   :  { %v1706_v9 = vpop.f32.mrb[1].mxu1 }
 0x262   :  { %v1707_v11 = vadd.f32 %v1706_v9, %v1705_v7  ;;  %v1708_v13 = vpop.f32.mrb[2].mxu1 }
 0x263   :  { %v1709_v14 = vpop.f32.mrb[3].mxu1 }
 0x264   :  { %v1710_v15 = vadd.f32 %v1709_v14, %v1708_v13  ;;  %v662_v16 = vadd.f32 %v1707_v11, %v2346_v10 }
 0x265   :  { %v1899_v18 = vpop.f32.mrb[16].mxu0 }
 0x266   :  { %v758_v19 = vpop.f32.mrb[17].mxu0  ;;  %v665_v20 = vadd.f32 %v1710_v15, %v2346_v10 }
 0x267   :  { %v759_v21 = vadd.f32 %v758_v19, %v662_v16  ;;  %v1900_v22 = vpop.f32.mrb[18].mxu0 }
 0x268   :  { %v1711_v23 = vpop.f32.mrb[4].mxu1  ;;  %v761_v24 = vpop.f32.mrb[19].mxu0 }
 0x269   :  { %vm821_vm10 = vcmp.ge.f32.partialorder %v759_v21, 0.0  ;;  %v837_v25 = vmul.f32 0.01, %v759_v21  ;;  %v762_v26 = vadd.f32 %v761_v24, %v665_v20  ;;  %v1712_v27 = vpop.f32.mrb[5].mxu1 }
 0x26a   :  { %v1713_v28 = vadd.f32 %v1712_v27, %v1711_v23  ;;  %v1714_v30 = vpop.f32.mrb[6].mxu1 }
 0x26b   :  { %v2350_v31 = vsel %vm821_vm10, %v759_v21, %v837_v25  ;;  %vm822_vm11 = vcmp.ge.f32.partialorder %v762_v26, 0.0  ;;  %v838_v32 = vmul.f32 0.01, %v762_v26  ;;  %v1715_v33 = vpop.f32.mrb[7].mxu1 }
 0x26c   :  { %v670_v35 = vadd.f32 %v1713_v28, %v2346_v10  ;;  %v1716_v36 = vadd.f32 %v1715_v33, %v1714_v30  ;;  %v869_v37 = vrot.slane %v2350_v31, 1  ;;  %v901_v39 = vrot.slane %v2350_v31, 2 }
 0x26d   :  { %v854_v40 = vsel %vm822_vm11, %v762_v26, %v838_v32  ;;  %v2355_v41 = vpop.f32.mrb[20].mxu0 }
 0x26e   :  { %v870_v42 = vrot.slane %v854_v40, 1  ;;  %v902_v44 = vrot.slane %v854_v40, 2  ;;  %v933_v43 = vpack.c.bf16 %v854_v40, %v2350_v31  ;;  %v767_v45 = vadd.f32 %v1899_v18, %v670_v35  ;;  %v774_v46 = vpop.f32.mrb[21].mxu0  ;;  %v2484_v31 = vld [vmem:[%s2612_s5] ss:$0 sm:$0xff]  ;;  %s2090_s5 = smov [#allocation7]  }
 0x26f   :  { %v673_v47 = vadd.f32 %v1716_v36, %v2346_v10  ;;  %v2359_v48 = vpop.f32.mrb[22].mxu0  ;;  %s1573_s20 = sshll.u32 %s2090_s5, 4  ;;  %s1574_s20 = int_to_ptr.vmem [resolvable:$true] %s1573_s20 }
 0x270   :  { %vm823_vm12 = vcmp.ge.f32.partialorder %v767_v45, 0.0  ;;  %v839_v49 = vmul.f32 0.01, %v767_v45  ;;  %v1717_v50 = vpop.f32.mrb[8].mxu1  ;;  %v777_v51 = vpop.f32.mrb[23].mxu0  ;;  %v899_v52 = vsel %vm354_vm8, %v869_v37, %v870_v42  ;;  %v931_v17 = vsel %vm387_vm9, %v901_v39, %v902_v44  ;;  %s2055_s2 = scalar_lea.vmem %s1574_s20, 32  ;;  %p2060_p3 = scmp.lt.s32.totalorder %s1574_s20, %s1574_s20 }
 0x271   :  { %v770_v53 = vadd.f32 %v1900_v22, %v673_v47  ;;  %v1718_v54 = vpop.f32.mrb[9].mxu1  ;;  %p2056_p2 = scmp.ne.s32.totalorder %s1574_s20, %s2055_s2  ;;  %p2061_p4 = scmp.lt.s32.totalorder %s2055_s2, %s2055_s2 }
 0x272   :  { %v2369_v55 = vsel %vm823_vm12, %v767_v45, %v839_v49  ;;  %v1719_v56 = vadd.f32 %v1718_v54, %v1717_v50  ;;  %v1720_v8 = vpop.f32.mrb[10].mxu1  ;;  %vm1516_vm12 = vcmask 1042434  }
 0x273   :  { %vm824_vm13 = vcmp.ge.f32.partialorder %v770_v53, 0.0  ;;  %v840_v57 = vmul.f32 0.01, %v770_v53  ;;  %v1721_v12 = vpop.f32.mrb[11].mxu1  ;;  %v871_v58 = vrot.slane %v2369_v55, 1  ;;  %v903_v29 = vrot.slane %v2369_v55, 2  ;;  %p2062_p5 = por %p2061_p4, %p2060_p3 }
 0x274   :  { %v678_v34 = vadd.f32 %v1719_v56, %v2346_v10  ;;  %v1722_v38 = vadd.f32 %v1721_v12, %v1720_v8 }
 0x275   :  { %v856_v59 = vsel %vm824_vm13, %v770_v53, %v840_v57  ;;  %v2374_v60 = vpop.f32.mrb[24].mxu0  ;;  %v898_v61 = vsel %vm354_vm8, %v870_v42, %v871_v58  ;;  %v930_v62 = vsel %vm387_vm9, %v902_v44, %v903_v29  ;;  %vm1519_vm13 = vcmask 1043459   ;;  %p2063_p6 = pnand %p2062_p5, %p2056_p2 }
 0x276   :  { %v904_v63 = vrot.slane %v856_v59, 2  ;;  %v775_v0 = vadd.f32 %v774_v46, %v678_v34  ;;  %v681_v1 = vadd.f32 %v1722_v38, %v2346_v10  ;;  %v2381_v2 = vpop.f32.mrb[25].mxu0  ;;  %v934_v3 = vpack.c.bf16 %v898_v61, %v899_v52 }
 0x277   :  { %v2383_v4 = vpop.f32.mrb[26].mxu0  ;;  %v935_v5 = vpack.c.bf16 %v930_v62, %v931_v17  ;;  %v872_v7 = vrot.slane %v856_v59, 1  ;;  %v936_v9 = vpack.c.bf16 %v856_v59, %v2369_v55 }
 0x278   :  { %vm825_vm14 = vcmp.ge.f32.partialorder %v775_v0, 0.0  ;;  %v841_v11 = vmul.f32 0.01, %v775_v0  ;;  %v778_v13 = vadd.f32 %v777_v51, %v681_v1  ;;  %v1723_v14 = vpop.f32.mrb[12].mxu1  ;;  %v2386_v15 = vpop.f32.mrb[27].mxu0  ;;  %1188 = vmatprep.mubr.bf16.mxu0 %v934_v3  ;;  %v929_v16 = vsel %vm387_vm9, %v903_v29, %v904_v63 }
 0x279   :  { %1929 = vmatprep.mubr.bf16.mxu1 %v935_v5  ;;  %v1724_v18 = vpop.f32.mrb[13].mxu1  ;;  %1189 = vmatmul.mubr.bf16.vlgmr.msra.gmra.mrb[32].mxu0 %v933_v43  ;;  %v897_v19 = vsel %vm354_vm8, %v871_v58, %v872_v7 }
 0x27a   :  { %v2392_v20 = vsel %vm825_vm14, %v775_v0, %v841_v11  ;;  %vm826_vm15 = vcmp.ge.f32.partialorder %v778_v13, 0.0  ;;  %v842_v21 = vmul.f32 0.01, %v778_v13  ;;  %v1725_v22 = vadd.f32 %v1724_v18, %v1723_v14  ;;  %v1726_v23 = vpop.f32.mrb[14].mxu1 }
 0x27b   :  { %v905_v24 = vrot.slane %v2392_v20, 2  ;;  %v1727_v25 = vpop.f32.mrb[15].mxu1  ;;  %v873_v26 = vrot.slane %v2392_v20, 1  ;;  %vm1522_vm14 = vcmask 1044484  }
 0x27c   :  { %v858_v27 = vsel %vm826_vm15, %v778_v13, %v842_v21  ;;  %v686_v28 = vadd.f32 %v1725_v22, %v2346_v10  ;;  %v1728_v30 = vadd.f32 %v1727_v25, %v1726_v23  ;;  %vm1525_vm15 = vcmask 1045509  }
 0x27d   :  { %v2397_v32 = vpop.f32.mrb[28].mxu0  ;;  %v896_v33 = vsel %vm354_vm8, %v872_v7, %v873_v26  ;;  %v928_v35 = vsel %vm387_vm9, %v904_v63, %v905_v24  ;;  %v874_v36 = vrot.slane %v858_v27, 1  ;;  %v906_v40 = vrot.slane %v858_v27, 2 }
 0x27e   :  { %v783_v42 = vadd.f32 %v2355_v41, %v686_v28  ;;  %v689_v44 = vadd.f32 %v1728_v30, %v2346_v10  ;;  %v2405_v43 = vpop.f32.mrb[29].mxu0  ;;  %v937_v45 = vpack.c.bf16 %v896_v33, %v897_v19  ;;  %v938_v46 = vpack.c.bf16 %v928_v35, %v929_v16 }
 0x27f   :  { %v2407_v47 = vpop.f32.mrb[30].mxu0  ;;  %v895_v49 = vsel %vm354_vm8, %v873_v26, %v874_v36  ;;  %v927_v50 = vsel %vm387_vm9, %v905_v24, %v906_v40  ;;  %v939_v51 = vpack.c.bf16 %v858_v27, %v2392_v20 }
 0x280   :  { %vm827_vm0 = vcmp.ge.f32.partialorder %v783_v42, 0.0  ;;  %v843_v52 = vmul.f32 0.01, %v783_v42  ;;  %v786_v41 = vadd.f32 %v2359_v48, %v689_v44  ;;  %v1729_v17 = vpop.f32.mrb[16].mxu1  ;;  %v2415_v53 = vpop.f32.mrb[31].mxu0  ;;  %1196 = vmatprep.mubr.bf16.mxu0 %v937_v45  ;;  %1930 = vmatmul.mubr.bf16.vlgmr.msra.gmra.mrb[32].mxu1 %v938_v46 }
 0x281   :  { %v1730_v54 = vpop.f32.mrb[17].mxu1  ;;  %1197 = vmatmul.mubr.bf16.gmra.mrb[36].mxu0 %v936_v9 }
 0x282   :  { %v859_v55 = vsel %vm827_vm0, %v783_v42, %v843_v52  ;;  %vm828_vm1 = vcmp.ge.f32.partialorder %v786_v41, 0.0  ;;  %v844_v56 = vmul.f32 0.01, %v786_v41  ;;  %v1731_v8 = vadd.f32 %v1730_v54, %v1729_v17  ;;  %v1732_v57 = vpop.f32.mrb[18].mxu1 }
 0x283   :  { %v1733_v12 = vpop.f32.mrb[19].mxu1  ;;  %v875_v58 = vrot.slane %v859_v55, 1  ;;  %v907_v29 = vrot.slane %v859_v55, 2  ;;  %vm1528_vm0 = vcmask 1046534  }
 0x284   :  { %v860_v34 = vsel %vm828_vm1, %v786_v41, %v844_v56  ;;  %v694_v38 = vadd.f32 %v1731_v8, %v2346_v10  ;;  %v1734_v59 = vadd.f32 %v1733_v12, %v1732_v57  ;;  %vm1531_vm1 = vcmask 1047559  }
 0x285   :  { %v894_v48 = vsel %vm354_vm8, %v874_v36, %v875_v58  ;;  %v926_v61 = vsel %vm387_vm9, %v906_v40, %v907_v29  ;;  %v876_v62 = vrot.slane %v860_v34, 1  ;;  %v908_v63 = vrot.slane %v860_v34, 2 }
 0x286   :  { %v791_v0 = vadd.f32 %v2381_v2, %v694_v38  ;;  %v697_v1 = vadd.f32 %v1734_v59, %v2346_v10  ;;  %v940_v3 = vpack.c.bf16 %v894_v48, %v895_v49  ;;  %v941_v5 = vpack.c.bf16 %v926_v61, %v927_v50 }
 0x287   :  { %v893_v7 = vsel %vm354_vm8, %v875_v58, %v876_v62  ;;  %v925_v9 = vsel %vm387_vm9, %v907_v29, %v908_v63  ;;  %v942_v11 = vpack.c.bf16 %v860_v34, %v859_v55 }
 0x288   :  { %vm829_vm2 = vcmp.ge.f32.partialorder %v791_v0, 0.0  ;;  %v845_v13 = vmul.f32 0.01, %v791_v0  ;;  %v794_v14 = vadd.f32 %v2386_v15, %v697_v1  ;;  %v1735_v16 = vpop.f32.mrb[20].mxu1  ;;  %1204 = vmatprep.mubr.bf16.mxu0 %v940_v3  ;;  %1933 = vmatprep.mubr.bf16.mxu1 %v941_v5 }
 0x289   :  { %v1736_v18 = vpop.f32.mrb[21].mxu1  ;;  %1205 = vmatmul.mubr.bf16.gmra.mrb[40].mxu0 %v939_v51 }
 0x28a   :  { %v861_v2 = vsel %vm829_vm2, %v791_v0, %v845_v13  ;;  %vm830_vm3 = vcmp.ge.f32.partialorder %v794_v14, 0.0  ;;  %v846_v19 = vmul.f32 0.01, %v794_v14  ;;  %v1737_v20 = vadd.f32 %v1736_v18, %v1735_v16  ;;  %v1738_v21 = vpop.f32.mrb[22].mxu1 }
 0x28b   :  { %v1739_v22 = vpop.f32.mrb[23].mxu1  ;;  %v877_v23 = vrot.slane %v861_v2, 1  ;;  %v909_v24 = vrot.slane %v861_v2, 2 }
 0x28c   :  { %v862_v25 = vsel %vm830_vm3, %v794_v14, %v846_v19  ;;  %v702_v26 = vadd.f32 %v1737_v20, %v2346_v10  ;;  %v1740_v27 = vadd.f32 %v1739_v22, %v1738_v21 }
 0x28d   :  { %v892_v15 = vsel %vm354_vm8, %v876_v62, %v877_v23  ;;  %v924_v28 = vsel %vm387_vm9, %v908_v63, %v909_v24  ;;  %v878_v30 = vrot.slane %v862_v25, 1  ;;  %v910_v33 = vrot.slane %v862_v25, 2 }
 0x28e   :  { %v799_v35 = vadd.f32 %v2374_v60, %v702_v26  ;;  %v705_v36 = vadd.f32 %v1740_v27, %v2346_v10  ;;  %v943_v40 = vpack.c.bf16 %v892_v15, %v893_v7  ;;  %v944_v42 = vpack.c.bf16 %v924_v28, %v925_v9 }
 0x28f   :  { %v891_v44 = vsel %vm354_vm8, %v877_v23, %v878_v30  ;;  %v923_v45 = vsel %vm387_vm9, %v909_v24, %v910_v33  ;;  %v945_v46 = vpack.c.bf16 %v862_v25, %v861_v2 }
 0x290   :  { %vm831_vm4 = vcmp.ge.f32.partialorder %v799_v35, 0.0  ;;  %v847_v49 = vmul.f32 0.01, %v799_v35  ;;  %v802_v50 = vadd.f32 %v2383_v4, %v705_v36  ;;  %v1741_v51 = vpop.f32.mrb[24].mxu1  ;;  %1212 = vmatprep.mubr.bf16.mxu0 %v943_v40  ;;  %1934 = vmatmul.mubr.bf16.gmra.mrb[36].mxu1 %v944_v42 }
 0x291   :  { %v1742_v52 = vpop.f32.mrb[25].mxu1  ;;  %1213 = vmatmul.mubr.bf16.gmra.mrb[44].mxu0 %v942_v11 }
 0x292   :  { %v863_v60 = vsel %vm831_vm4, %v799_v35, %v847_v49  ;;  %vm832_vm5 = vcmp.ge.f32.partialorder %v802_v50, 0.0  ;;  %v848_v41 = vmul.f32 0.01, %v802_v50  ;;  %v1743_v17 = vadd.f32 %v1742_v52, %v1741_v51  ;;  %v1744_v54 = vpop.f32.mrb[26].mxu1 }
 0x293   :  { %v1745_v55 = vpop.f32.mrb[27].mxu1  ;;  %v879_v56 = vrot.slane %v863_v60, 1  ;;  %v911_v8 = vrot.slane %v863_v60, 2 }
 0x294   :  { %v864_v57 = vsel %vm832_vm5, %v802_v50, %v848_v41  ;;  %v710_v12 = vadd.f32 %v1743_v17, %v2346_v10  ;;  %v1746_v58 = vadd.f32 %v1745_v55, %v1744_v54 }
 0x295   :  { %v890_v4 = vsel %vm354_vm8, %v878_v30, %v879_v56  ;;  %v922_v29 = vsel %vm387_vm9, %v910_v33, %v911_v8  ;;  %v880_v34 = vrot.slane %v864_v57, 1  ;;  %v912_v38 = vrot.slane %v864_v57, 2 }
 0x296   :  { %v807_v59 = vadd.f32 %v2405_v43, %v710_v12  ;;  %v713_v48 = vadd.f32 %v1746_v58, %v2346_v10  ;;  %v946_v61 = vpack.c.bf16 %v890_v4, %v891_v44  ;;  %v947_v62 = vpack.c.bf16 %v922_v29, %v923_v45 }
 0x297   :  { %v889_v63 = vsel %vm354_vm8, %v879_v56, %v880_v34  ;;  %v921_v0 = vsel %vm387_vm9, %v911_v8, %v912_v38  ;;  %v948_v1 = vpack.c.bf16 %v864_v57, %v863_v60 }
 0x298   :  { %vm833_vm6 = vcmp.ge.f32.partialorder %v807_v59, 0.0  ;;  %v849_v3 = vmul.f32 0.01, %v807_v59  ;;  %v810_v5 = vadd.f32 %v2415_v53, %v713_v48  ;;  %v1747_v7 = vpop.f32.mrb[28].mxu1  ;;  %1220 = vmatprep.mubr.bf16.mxu0 %v946_v61  ;;  %1937 = vmatprep.mubr.bf16.mxu1 %v947_v62 }
 0x299   :  { %v1748_v9 = vpop.f32.mrb[29].mxu1  ;;  %1221 = vmatmul.mubr.bf16.gmra.mrb[48].mxu0 %v945_v46 }
 0x29a   :  { %v865_v43 = vsel %vm833_vm6, %v807_v59, %v849_v3  ;;  %vm834_vm7 = vcmp.ge.f32.partialorder %v810_v5, 0.0  ;;  %v850_v11 = vmul.f32 0.01, %v810_v5  ;;  %v1749_v13 = vadd.f32 %v1748_v9, %v1747_v7  ;;  %v1750_v14 = vpop.f32.mrb[30].mxu1 }
 0x29b   :  { %v1751_v16 = vpop.f32.mrb[31].mxu1  ;;  %v881_v18 = vrot.slane %v865_v43, 1  ;;  %v913_v2 = vrot.slane %v865_v43, 2 }
 0x29c   :  { %v866_v19 = vsel %vm834_vm7, %v810_v5, %v850_v11  ;;  %v718_v20 = vadd.f32 %v1749_v13, %v2346_v10  ;;  %v1752_v21 = vadd.f32 %v1751_v16, %v1750_v14 }
 0x29d   :  { %v888_v53 = vsel %vm354_vm8, %v880_v34, %v881_v18  ;;  %v920_v22 = vsel %vm387_vm9, %v912_v38, %v913_v2  ;;  %v882_v23 = vrot.slane %v866_v19, 1  ;;  %v914_v24 = vrot.slane %v866_v19, 2 }
 0x29e   :  { %v815_v25 = vadd.f32 %v2397_v32, %v718_v20  ;;  %v721_v26 = vadd.f32 %v1752_v21, %v2346_v10  ;;  %v949_v27 = vpack.c.bf16 %v888_v53, %v889_v63  ;;  %v950_v15 = vpack.c.bf16 %v920_v22, %v921_v0 }
 0x29f   :  { %v887_v28 = vsel %vm354_vm8, %v881_v18, %v882_v23  ;;  %v919_v30 = vsel %vm387_vm9, %v913_v2, %v914_v24  ;;  %v951_v33 = vpack.c.bf16 %v866_v19, %v865_v43 }
 0x2a0   :  { %vm835_vm10 = vcmp.ge.f32.partialorder %v815_v25, 0.0  ;;  %v851_v35 = vmul.f32 0.01, %v815_v25  ;;  %v818_v36 = vadd.f32 %v2407_v47, %v721_v26  ;;  %1228 = vmatprep.mubr.bf16.mxu0 %v949_v27  ;;  %1938 = vmatmul.mubr.bf16.gmra.mrb[40].mxu1 %v950_v15 }
 0x2a1   :  { %1229 = vmatmul.mubr.bf16.gmra.mrb[52].mxu0 %v948_v1 }
 0x2a2   :  { %v867_v40 = vsel %vm835_vm10, %v815_v25, %v851_v35  ;;  %vm836_vm11 = vcmp.ge.f32.partialorder %v818_v36, 0.0  ;;  %v852_v32 = vmul.f32 0.01, %v818_v36 }
 0x2a3   :  { %v883_v10 = vrot.slane %v867_v40, 1  ;;  %v915_v42 = vrot.slane %v867_v40, 2 }
 0x2a4   :  { %v868_v44 = vsel %vm836_vm11, %v818_v36, %v852_v32 }
 0x2a5   :  { %v886_v45 = vsel %vm354_vm8, %v882_v23, %v883_v10  ;;  %v918_v46 = vsel %vm387_vm9, %v914_v24, %v915_v42  ;;  %v884_v49 = vrot.slane %v868_v44, 1  ;;  %v916_v50 = vrot.slane %v868_v44, 2 }
 0x2a6   :  { %v952_v51 = vpack.c.bf16 %v886_v45, %v887_v28  ;;  %v953_v52 = vpack.c.bf16 %v918_v46, %v919_v30  ;;  %v954_v47 = vpack.c.bf16 %v868_v44, %v867_v40  ;;  %v2089_v30 = vmov -0.25  }
 0x2a7   :  { %v885_v60 = vsel %vm354_vm8, %v883_v10, %v884_v49  ;;  %v900_v41 = vsel %vm354_vm8, %v884_v49, %v869_v37  ;;  %v917_v17 = vsel %vm387_vm9, %v915_v42, %v916_v50  ;;  %v932_v54 = vsel %vm387_vm9, %v916_v50, %v901_v39 }
 0x2a8   :  { %1236 = vmatprep.mubr.bf16.mxu0 %v952_v51  ;;  %1941 = vmatprep.mubr.bf16.mxu1 %v953_v52  ;;  %v955_v55 = vpack.c.bf16 %v900_v41, %v885_v60  ;;  %v956_v56 = vpack.c.bf16 %v932_v54, %v917_v17  ;;  %vm1350_vm8 = vcmp.lt.s32.totalorder %v2224_v6, 4  ;;  %vm1513_vm9 = vcmask 1041409  }
 0x2a9   :  { %1237 = vmatmul.mubr.bf16.gmra.mrb[56].mxu0 %v951_v33  ;;  %v2501_v33 = vsel %vm1350_vm8, 0.25, %v2089_v30 }
 0x2aa   :  { %1244 = vmatprep.mubr.bf16.mxu0 %v955_v55  ;;  %1942 = vmatmul.mubr.bf16.gmra.mrb[44].mxu1 %v956_v56  ;;  %v1465_v49 = vrot.slane %v2501_v33, 1  ;;  %v1466_v41 = vrot.slane %v2501_v33, 2  ;;  %v1467_v54 = vrot.slane %v2501_v33, 3 }
 0x2b1   :  { %1245 = vmatmul.mubr.bf16.gmra.mrb[60].mxu0 %v954_v47 }
 0x34c   :  { %v1785_v8 = vpop.f32.mrb[32].mxu0 }
 0x34d   :  { %v1786_v57 = vpop.f32.mrb[33].mxu0 }
 0x34e   :  { %v1787_v12 = vadd.f32 %v1786_v57, %v1785_v8  ;;  %v1788_v37 = vpop.f32.mrb[34].mxu0 }
 0x34f   :  { %v1789_v58 = vpop.f32.mrb[35].mxu0 }
 0x350   :  { %v1790_v4 = vadd.f32 %v1789_v58, %v1788_v37  ;;  %v1191_v29 = vadd.f32 %v1787_v12, %v2484_v31 }
 0x352   :  { %v1194_v62 = vadd.f32 %v1790_v4, %v2484_v31 }
 0x353   :  { %v1931_v39 = vpop.f32.mrb[32].mxu1 }
 0x354   :  { %v1791_v34 = vpop.f32.mrb[36].mxu0  ;;  %v1287_v38 = vpop.f32.mrb[33].mxu1 }
 0x355   :  { %v1288_v59 = vadd.f32 %v1287_v38, %v1191_v29  ;;  %v1792_v48 = vpop.f32.mrb[37].mxu0  ;;  %v1932_v61 = vpop.f32.mrb[34].mxu1 }
 0x356   :  { %v1793_v63 = vadd.f32 %v1792_v48, %v1791_v34  ;;  %v1794_v0 = vpop.f32.mrb[38].mxu0  ;;  %v1290_v1 = vpop.f32.mrb[35].mxu1 }
 0x357   :  { %v1351_v3 = vsel %vm1350_vm8, %v1288_v59, -inf  ;;  %v1291_v5 = vadd.f32 %v1290_v1, %v1194_v62  ;;  %v1795_v7 = vpop.f32.mrb[39].mxu0 }
 0x358   :  { %v1367_v9 = vrot.slane %v1351_v3, 4  ;;  %v1199_v43 = vadd.f32 %v1793_v63, %v2484_v31  ;;  %v1796_v11 = vadd.f32 %v1795_v7, %v1794_v0 }
 0x359   :  { %v1352_v13 = vsel %vm1350_vm8, %v1291_v5, -inf }
 0x35a   :  { %v1368_v14 = vmax.f32 %v1351_v3, %v1367_v9  ;;  %v1296_v16 = vadd.f32 %v1931_v39, %v1199_v43  ;;  %v1373_v18 = vrot.slane %v1352_v13, 4  ;;  %v1202_v2 = vadd.f32 %v1796_v11, %v2484_v31 }
 0x35c   :  { %v1369_v19 = vrot.slane %v1368_v14, 2  ;;  %v1353_v20 = vsel %vm1350_vm8, %v1296_v16, -inf  ;;  %v1374_v21 = vmax.f32 %v1352_v13, %v1373_v18  ;;  %v1299_v53 = vadd.f32 %v1932_v61, %v1202_v2  ;;  %v1797_v22 = vpop.f32.mrb[40].mxu0 }
 0x35d   :  { %v1379_v23 = vrot.slane %v1353_v20, 4  ;;  %v1798_v24 = vpop.f32.mrb[41].mxu0 }
 0x35e   :  { %v1370_v25 = vmax.f32 %v1368_v14, %v1369_v19  ;;  %v1375_v26 = vrot.slane %v1374_v21, 2  ;;  %v1354_v27 = vsel %vm1350_vm8, %v1299_v53, -inf  ;;  %v1799_v15 = vadd.f32 %v1798_v24, %v1797_v22  ;;  %v1800_v28 = vpop.f32.mrb[42].mxu0 }
 0x35f   :  { %v1380_v35 = vmax.f32 %v1353_v20, %v1379_v23  ;;  %v1385_v36 = vrot.slane %v1354_v27, 4  ;;  %v1801_v40 = vpop.f32.mrb[43].mxu0 }
 0x360   :  { %v1371_v32 = vrot.slane %v1370_v25, 1  ;;  %v1376_v10 = vmax.f32 %v1374_v21, %v1375_v26  ;;  %v1802_v42 = vadd.f32 %v1801_v40, %v1800_v28  ;;  %v1207_v47 = vadd.f32 %v1799_v15, %v2484_v31 }
 0x361   :  { %v1381_v44 = vrot.slane %v1380_v35, 2  ;;  %v1386_v45 = vmax.f32 %v1354_v27, %v1385_v36 }
 0x362   :  { %v1377_v46 = vrot.slane %v1376_v10, 1  ;;  %v1372_v60 = vmax.f32 %v1370_v25, %v1371_v32  ;;  %v1210_v4 = vadd.f32 %v1802_v42, %v2484_v31 }
 0x363   :  { %v1382_v50 = vmax.f32 %v1380_v35, %v1381_v44  ;;  %v1387_v51 = vrot.slane %v1386_v45, 2  ;;  %v1935_v52 = vpop.f32.mrb[36].mxu1 }
 0x364   :  { %v1378_v17 = vmax.f32 %v1376_v10, %v1377_v46  ;;  %v1803_v55 = vpop.f32.mrb[44].mxu0  ;;  %v1303_v56 = vpop.f32.mrb[37].mxu1  ;;  %v1480_v7 = vmul.f32 %v2501_v33, %v1372_v60  ;;  %v1468_v46 = vrot.slane %v2501_v33, 4 }
 0x365   :  { %v1383_v8 = vrot.slane %v1382_v50, 1  ;;  %v1388_v57 = vmax.f32 %v1386_v45, %v1387_v51  ;;  %v1304_v12 = vadd.f32 %v1303_v56, %v1207_v47  ;;  %v1804_v37 = vpop.f32.mrb[45].mxu0  ;;  %v1936_v58 = vpop.f32.mrb[38].mxu1  ;;  %v1469_v56 = vrot.slane %v2501_v33, 5 }
 0x366   :  { %v1481_v39 = vmul.f32 %v1465_v49, %v1378_v17  ;;  %v1805_v29 = vadd.f32 %v1804_v37, %v1803_v55  ;;  %v1806_v34 = vpop.f32.mrb[46].mxu0  ;;  %v1306_v38 = vpop.f32.mrb[39].mxu1  ;;  %v1470_v17 = vrot.slane %v2501_v33, 6 }
 0x367   :  { %v1384_v59 = vmax.f32 %v1382_v50, %v1383_v8  ;;  %v1389_v48 = vrot.slane %v1388_v57, 1  ;;  %v1355_v61 = vsel %vm1350_vm8, %v1304_v12, -inf  ;;  %v1307_v62 = vadd.f32 %v1306_v38, %v1210_v4  ;;  %v1807_v63 = vpop.f32.mrb[47].mxu0 }
 0x368   :  { %v1512_v0 = vrot.slane %v1481_v39, 7  ;;  %v1391_v1 = vrot.slane %v1355_v61, 4  ;;  %v1215_v3 = vadd.f32 %v1805_v29, %v2484_v31  ;;  %v1808_v5 = vadd.f32 %v1807_v63, %v1806_v34 }
 0x369   :  { %v1482_v9 = vmul.f32 %v1466_v41, %v1384_v59  ;;  %v1390_v43 = vmax.f32 %v1388_v57, %v1389_v48  ;;  %v1356_v11 = vsel %vm1350_vm8, %v1307_v62, -inf  ;;  %v1471_v39 = vrot.slane %v2501_v33, 7 }
 0x36a   :  { %v1392_v13 = vmax.f32 %v1355_v61, %v1391_v1  ;;  %v1312_v14 = vadd.f32 %v1935_v52, %v1215_v3  ;;  %v1397_v16 = vrot.slane %v1356_v11, 4  ;;  %v1218_v18 = vadd.f32 %v1808_v5, %v2484_v31 }
 0x36b   :  { %v1483_v2 = vmul.f32 %v1467_v54, %v1390_v43  ;;  %v1514_v19 = vsel %vm1513_vm9, %v1512_v0, %v1480_v7  ;;  %v1515_v20 = vrot.slane %v1482_v9, 6 }
 0x36c   :  { %v1393_v21 = vrot.slane %v1392_v13, 2  ;;  %v1357_v53 = vsel %vm1350_vm8, %v1312_v14, -inf  ;;  %v1398_v22 = vmax.f32 %v1356_v11, %v1397_v16  ;;  %v1315_v23 = vadd.f32 %v1936_v58, %v1218_v18  ;;  %v1809_v24 = vpop.f32.mrb[48].mxu0 }
 0x36d   :  { %v1518_v25 = vrot.slane %v1483_v2, 5  ;;  %v1403_v26 = vrot.slane %v1357_v53, 4  ;;  %v1810_v27 = vpop.f32.mrb[49].mxu0  ;;  %v1517_v15 = vsel %vm1516_vm12, %v1515_v20, %v1514_v19 }
 0x36e   :  { %v1394_v28 = vmax.f32 %v1392_v13, %v1393_v21  ;;  %v1399_v30 = vrot.slane %v1398_v22, 2  ;;  %v1358_v35 = vsel %vm1350_vm8, %v1315_v23, -inf  ;;  %v1811_v36 = vadd.f32 %v1810_v27, %v1809_v24  ;;  %v1812_v40 = vpop.f32.mrb[50].mxu0 }
 0x36f   :  { %v1404_v32 = vmax.f32 %v1357_v53, %v1403_v26  ;;  %v1409_v10 = vrot.slane %v1358_v35, 4  ;;  %v1813_v42 = vpop.f32.mrb[51].mxu0  ;;  %v1520_v44 = vsel %vm1519_vm13, %v1518_v25, %v1517_v15 }
 0x370   :  { %v1395_v45 = vrot.slane %v1394_v28, 1  ;;  %v1400_v50 = vmax.f32 %v1398_v22, %v1399_v30  ;;  %v1814_v51 = vadd.f32 %v1813_v42, %v1812_v40  ;;  %v1223_v37 = vadd.f32 %v1811_v36, %v2484_v31 }
 0x371   :  { %v1405_v52 = vrot.slane %v1404_v32, 2  ;;  %v1410_v47 = vmax.f32 %v1358_v35, %v1409_v10 }
 0x372   :  { %v1396_v60 = vmax.f32 %v1394_v28, %v1395_v45  ;;  %v1401_v55 = vrot.slane %v1400_v50, 1  ;;  %v1226_v63 = vadd.f32 %v1814_v51, %v2484_v31 }
 0x373   :  { %v1406_v8 = vmax.f32 %v1404_v32, %v1405_v52  ;;  %v1411_v57 = vrot.slane %v1410_v47, 2  ;;  %v1939_v12 = vpop.f32.mrb[40].mxu1 }
 0x374   :  { %v1484_v58 = vmul.f32 %v1468_v46, %v1396_v60  ;;  %v1402_v4 = vmax.f32 %v1400_v50, %v1401_v55  ;;  %v1815_v29 = vpop.f32.mrb[52].mxu0  ;;  %v1319_v34 = vpop.f32.mrb[41].mxu1 }
 0x375   :  { %v1407_v38 = vrot.slane %v1406_v8, 1  ;;  %v1412_v59 = vmax.f32 %v1410_v47, %v1411_v57  ;;  %v1320_v48 = vadd.f32 %v1319_v34, %v1223_v37  ;;  %v1816_v61 = vpop.f32.mrb[53].mxu0  ;;  %v1940_v62 = vpop.f32.mrb[42].mxu1 }
 0x376   :  { %v1521_v0 = vrot.slane %v1484_v58, 4  ;;  %v1485_v1 = vmul.f32 %v1469_v56, %v1402_v4  ;;  %v1817_v3 = vadd.f32 %v1816_v61, %v1815_v29  ;;  %v1818_v5 = vpop.f32.mrb[54].mxu0  ;;  %v1322_v7 = vpop.f32.mrb[43].mxu1 }
 0x377   :  { %v1408_v9 = vmax.f32 %v1406_v8, %v1407_v38  ;;  %v1413_v43 = vrot.slane %v1412_v59, 1  ;;  %v1359_v11 = vsel %vm1350_vm8, %v1320_v48, -inf  ;;  %v1323_v13 = vadd.f32 %v1322_v7, %v1226_v63  ;;  %v1819_v14 = vpop.f32.mrb[55].mxu0 }
 0x378   :  { %v1524_v16 = vrot.slane %v1485_v1, 3  ;;  %v1415_v18 = vrot.slane %v1359_v11, 4  ;;  %v1231_v2 = vadd.f32 %v1817_v3, %v2484_v31  ;;  %v1820_v19 = vadd.f32 %v1819_v14, %v1818_v5 }
 0x379   :  { %v1486_v20 = vmul.f32 %v1470_v17, %v1408_v9  ;;  %v1414_v21 = vmax.f32 %v1412_v59, %v1413_v43  ;;  %v1360_v53 = vsel %vm1350_vm8, %v1323_v13, -inf  ;;  %v1523_v22 = vsel %vm1522_vm14, %v1521_v0, %v1520_v44 }
 0x37a   :  { %v1416_v23 = vmax.f32 %v1359_v11, %v1415_v18  ;;  %v1328_v24 = vadd.f32 %v1939_v12, %v1231_v2  ;;  %v1421_v25 = vrot.slane %v1360_v53, 4  ;;  %v1234_v26 = vadd.f32 %v1820_v19, %v2484_v31 }
 0x37b   :  { %v1527_v27 = vrot.slane %v1486_v20, 2  ;;  %v1487_v15 = vmul.f32 %v1471_v39, %v1414_v21  ;;  %v1526_v28 = vsel %vm1525_vm15, %v1524_v16, %v1523_v22 }
 0x37c   :  { %v1417_v30 = vrot.slane %v1416_v23, 2  ;;  %v1361_v35 = vsel %vm1350_vm8, %v1328_v24, -inf  ;;  %v1422_v36 = vmax.f32 %v1360_v53, %v1421_v25  ;;  %v1331_v40 = vadd.f32 %v1940_v62, %v1234_v26  ;;  %v1821_v32 = vpop.f32.mrb[56].mxu0 }
 0x37d   :  { %v1530_v10 = vrot.slane %v1487_v15, 1  ;;  %v1427_v42 = vrot.slane %v1361_v35, 4  ;;  %v1822_v44 = vpop.f32.mrb[57].mxu0  ;;  %v1943_v45 = vpop.f32.mrb[44].mxu1  ;;  %v1529_v50 = vsel %vm1528_vm0, %v1527_v27, %v1526_v28 }
 0x37e   :  { %v1418_v51 = vmax.f32 %v1416_v23, %v1417_v30  ;;  %v1423_v52 = vrot.slane %v1422_v36, 2  ;;  %v1362_v47 = vsel %vm1350_vm8, %v1331_v40, -inf  ;;  %v1823_v60 = vadd.f32 %v1822_v44, %v1821_v32  ;;  %v1824_v55 = vpop.f32.mrb[58].mxu0  ;;  %v1335_v8 = vpop.f32.mrb[45].mxu1 }
 0x37f   :  { %v1428_v57 = vmax.f32 %v1361_v35, %v1427_v42  ;;  %v1433_v12 = vrot.slane %v1362_v47, 4  ;;  %v1825_v37 = vpop.f32.mrb[59].mxu0  ;;  %v1944_v58 = vpop.f32.mrb[46].mxu1  ;;  %v2556_v4 = vsel %vm1531_vm1, %v1530_v10, %v1529_v50 }
 0x380   :  { %v1419_v29 = vrot.slane %v1418_v51, 1  ;;  %v1424_v34 = vmax.f32 %v1422_v36, %v1423_v52  ;;  %v1239_v38 = vadd.f32 %v1823_v60, %v2484_v31  ;;  %v1826_v59 = vadd.f32 %v1825_v37, %v1824_v55  ;;  %v1338_v48 = vpop.f32.mrb[47].mxu1 }
 0x381   :  { %v1429_v61 = vrot.slane %v1428_v57, 2  ;;  %v1434_v62 = vmax.f32 %v1362_v47, %v1433_v12 }
 0x382   :  { %v1425_v63 = vrot.slane %v1424_v34, 1  ;;  %v1336_v0 = vadd.f32 %v1335_v8, %v1239_v38  ;;  %v1242_v1 = vadd.f32 %v1826_v59, %v2484_v31  ;;  %v1420_v7 = vmax.f32 %v1418_v51, %v1419_v29 }
 0x383   :  { %v1430_v3 = vmax.f32 %v1428_v57, %v1429_v61  ;;  %v1435_v5 = vrot.slane %v1434_v62, 2 }
 0x384   :  { %v1426_v9 = vmax.f32 %v1424_v34, %v1425_v63  ;;  %v1363_v43 = vsel %vm1350_vm8, %v1336_v0, -inf  ;;  %v1339_v11 = vadd.f32 %v1338_v48, %v1242_v1  ;;  %v1827_v13 = vpop.f32.mrb[60].mxu0  ;;  %v1488_v27 = vmul.f32 %v2501_v33, %v1420_v7 }
 0x385   :  { %v1431_v14 = vrot.slane %v1430_v3, 1  ;;  %v1436_v16 = vmax.f32 %v1434_v62, %v1435_v5  ;;  %v1439_v18 = vrot.slane %v1363_v43, 4  ;;  %v1828_v2 = vpop.f32.mrb[61].mxu0 }
 0x386   :  { %v1489_v19 = vmul.f32 %v1465_v49, %v1426_v9  ;;  %v1364_v20 = vsel %vm1350_vm8, %v1339_v11, -inf  ;;  %v1829_v21 = vadd.f32 %v1828_v2, %v1827_v13  ;;  %v1830_v53 = vpop.f32.mrb[62].mxu0 }
 0x387   :  { %v1432_v22 = vmax.f32 %v1430_v3, %v1431_v14  ;;  %v1437_v23 = vrot.slane %v1436_v16, 1  ;;  %v1440_v24 = vmax.f32 %v1363_v43, %v1439_v18  ;;  %v1445_v25 = vrot.slane %v1364_v20, 4  ;;  %v1831_v26 = vpop.f32.mrb[63].mxu0 }
 0x388   :  { %v1533_v15 = vrot.slane %v1489_v19, 7  ;;  %v1247_v28 = vadd.f32 %v1829_v21, %v2484_v31  ;;  %v1832_v30 = vadd.f32 %v1831_v26, %v1830_v53 }
 0x389   :  { %v1490_v35 = vmul.f32 %v1466_v41, %v1432_v22  ;;  %v1438_v49 = vmax.f32 %v1436_v16, %v1437_v23  ;;  %v1441_v36 = vrot.slane %v1440_v24, 2  ;;  %v1446_v40 = vmax.f32 %v1364_v20, %v1445_v25 }
 0x38a   :  { %v1344_v32 = vadd.f32 %v1943_v45, %v1247_v28  ;;  %v1250_v10 = vadd.f32 %v1832_v30, %v2484_v31  ;;  %v1534_v42 = vsel %vm1513_vm9, %v1533_v15, %v1488_v27 }
 0x38b   :  { %v1491_v44 = vmul.f32 %v1467_v54, %v1438_v49  ;;  %v1442_v50 = vmax.f32 %v1440_v24, %v1441_v36  ;;  %v1447_v51 = vrot.slane %v1446_v40, 2  ;;  %v1535_v52 = vrot.slane %v1490_v35, 6 }
 0x38c   :  { %v1365_v47 = vsel %vm1350_vm8, %v1344_v32, -inf  ;;  %v1347_v60 = vadd.f32 %v1944_v58, %v1250_v10 }
 0x38d   :  { %v1537_v55 = vrot.slane %v1491_v44, 5  ;;  %v1443_v41 = vrot.slane %v1442_v50, 1  ;;  %v1448_v8 = vmax.f32 %v1446_v40, %v1447_v51  ;;  %v1451_v57 = vrot.slane %v1365_v47, 4 }
 0x38e   :  { %v1366_v45 = vsel %vm1350_vm8, %v1347_v60, -inf  ;;  %v1536_v31 = vsel %vm1516_vm12, %v1535_v52, %v1534_v42 }
 0x38f   :  { %v1444_v12 = vmax.f32 %v1442_v50, %v1443_v41  ;;  %v1449_v37 = vrot.slane %v1448_v8, 1  ;;  %v1452_v29 = vmax.f32 %v1365_v47, %v1451_v57  ;;  %v1457_v54 = vrot.slane %v1366_v45, 4 }
 0x390   :  { %v1538_v34 = vsel %vm1519_vm13, %v1537_v55, %v1536_v31 }
 0x391   :  { %v1492_v38 = vmul.f32 %v1468_v46, %v1444_v12  ;;  %v1450_v59 = vmax.f32 %v1448_v8, %v1449_v37  ;;  %v1453_v58 = vrot.slane %v1452_v29, 2  ;;  %v1458_v48 = vmax.f32 %v1366_v45, %v1457_v54 }
 0x392   :  { %v1549_v46 = vrot.slane %v2556_v4, 4 }
 0x393   :  { %v1539_v61 = vrot.slane %v1492_v38, 4  ;;  %v1493_v62 = vmul.f32 %v1469_v56, %v1450_v59  ;;  %v1454_v6 = vmax.f32 %v1452_v29, %v1453_v58  ;;  %v1459_v63 = vrot.slane %v1458_v48, 2 }
 0x394   :  { %v1550_v16 = vadd.f32 %v1549_v46, %v2556_v4 }
 0x395   :  { %v1541_v0 = vrot.slane %v1493_v62, 3  ;;  %v1455_v1 = vrot.slane %v1454_v6, 1  ;;  %v1460_v3 = vmax.f32 %v1458_v48, %v1459_v63  ;;  %v1540_v5 = vsel %vm1522_vm14, %v1539_v61, %v1538_v34 }
 0x396   :  { %v1551_v20 = vrot.slane %v1550_v16, 2 }
 0x397   :  { %v1456_v7 = vmax.f32 %v1454_v6, %v1455_v1  ;;  %v1461_v9 = vrot.slane %v1460_v3, 1  ;;  %v1542_v43 = vsel %vm1525_vm15, %v1541_v0, %v1540_v5 }
 0x398   :  { %v1552_v22 = vadd.f32 %v1551_v20, %v1550_v16 }
 0x399   :  { %v1494_v11 = vmul.f32 %v1470_v17, %v1456_v7  ;;  %v1462_v13 = vmax.f32 %v1460_v3, %v1461_v9 }
 0x39a   :  { %v1553_v25 = vrot.slane %v1552_v22, 1 }
 0x39b   :  { %v1543_v14 = vrot.slane %v1494_v11, 2  ;;  %v1495_v56 = vmul.f32 %v1471_v39, %v1462_v13 }
 0x39c   :  { %v1554_v33 = vadd.f32 %v1553_v25, %v1552_v22 }
 0x39d   :  { %v1545_v18 = vrot.slane %v1495_v56, 1  ;;  %v1544_v2 = vsel %vm1528_vm0, %v1543_v14, %v1542_v43 }
 0x39f   :  { %v1546_v19 = vsel %vm1531_vm1, %v1545_v18, %v1544_v2 }
 0x3a0   :  { %v1555_v21 = vrot.slane %v1546_v19, 4 }
 0x3a2   :  { %v1556_v53 = vadd.f32 %v1555_v21, %v1546_v19 }
 0x3a4   :  { %v1557_v23 = vrot.slane %v1556_v53, 2 }
 0x3a6   :  { %v1558_v24 = vadd.f32 %v1557_v23, %v1556_v53 }
 0x3a8   :  { %v1559_v17 = vrot.slane %v1558_v24, 1 }
 0x3aa   :  { %v1560_v26 = vadd.f32 %v1559_v17, %v1558_v24 }
 0x3ac   :  { %v1563_v39 = vrot.slane %v1560_v26, 7 }
 0x3ae   :  { %v1564_v4 = vsel %vm1513_vm9, %v1563_v39, %v1554_v33 }
 0x3af   :  { %1566 = vst [vmem:[#allocation7] sm:$0x3] %v1564_v4 }
 0x3b0   :  { %2066 = shalt.err (!%p2063_p6)
}
 0x3b1   :  { %s2067_s23 = scalar_lea.hbm %s2613_s6, 32 }
 0x3b2   :  { %p2068_p7 = scmp.ne.s32.totalorder %s2613_s6, %s2067_s23  ;;  %p2071_p8 = scmp.lt.u32.totalorder %s2067_s23, %s2613_s6 }
 0x3b4   :  { %p2073_p9 = pnand %p2071_p8, %p2068_p7 }
 0x3b6   :  { %2076 = shalt.err (!%p2073_p9)
}
 0x3b7   :  { %1576 = dma.vmem_to_hbm [thread:$0]  %s1574_s20, 32, %s2613_s6, [#allocation4]  }
 0x3b8   :  { %2081 = dma.done.wait [#allocation4], 32  }
 0x3b9   :  { %2082 = vsyncadd [#allocation4], 4294967264 }
 0x3ba   :  { %1580 = vsyncpa [#allocation3], 1 }
 0x3bb   :  { %1581 = vsyncpa [#allocation6], 1 }
 0x3bc   :  { %1582 = vsyncpa [#allocation4], 1 }

</bundles_post_ra>
